<compile_context>
chip_gen: v7x
topology: tpu7x:2x2x1
jax: 0.10.0
libtpu: 0.0.40
codegen_flags: <defaults>
</compile_context>

<pallas_src>
import functools

import jax
import jax.numpy as jnp
from jax import lax
from jax.experimental import pallas as pl
from jax.experimental.pallas import tpu as pltpu


def _round_up(x, m):
    return ((x + m - 1) // m) * m


# ----------------------------------------------------------------------------
# concat(claim, evidence): per-row, prepend the nonzero-prefix of `claim` to
# `evidence`, truncate to claim.size(1).  Pure JAX glue (integer index math).
# ----------------------------------------------------------------------------
def concat_jax(claim, evidence):
    n, seq_len = claim.shape
    nzl = jnp.sum((claim != 0).astype(jnp.int32), axis=1, keepdims=True)   # [N,1]
    pos = jnp.arange(seq_len, dtype=jnp.int32)[None, :]                    # [1,L]
    ev_idx = jnp.clip(pos - nzl, 0, seq_len - 1)
    gathered_ev = jnp.take_along_axis(evidence, ev_idx, axis=1)
    return jnp.where(pos < nzl, claim, gathered_ev)


# ----------------------------------------------------------------------------
# One-time parameter preparation: vocab padded to a lane multiple, MXU weights
# pre-cast to bf16 (no per-call cast kernels), w2 stored as a [1,64] VPU row.
# ----------------------------------------------------------------------------
def prepare_params(raw, vocab, hidden):
    v_pad = _round_up(vocab, 128)
    emb_pad = jnp.zeros((v_pad, hidden), jnp.float32).at[:vocab].set(raw["emb"])
    return {
        "emb": emb_pad.astype(jnp.bfloat16),                 # [V_pad, H] bf16 (MXU)
        "type_emb": raw["type_emb"].astype(jnp.float32),     # [2, H]
        "w_pool": raw["w_pool"].astype(jnp.bfloat16),        # [H, H]  (MXU)
        "b_pool": raw["b_pool"].astype(jnp.float32),         # [1, H]
        "w1a": raw["w1a"].astype(jnp.bfloat16),              # [H, 64] (MXU)
        "w1b": raw["w1b"].astype(jnp.bfloat16),              # [H, 64] (MXU)
        "b1": raw["b1"].astype(jnp.float32),                 # [1, 64]
        "w2_row": raw["w2"].reshape(1, -1).astype(jnp.float32),  # [1, 64] (VPU)
        "b2": raw["b2"].astype(jnp.float32),                 # [1, 1]
        "wc": raw["wc"].astype(jnp.bfloat16),                # [H, 3]  (MXU)
        "bc": raw["bc"].astype(jnp.float32),                 # [1, 3]
    }


# ----------------------------------------------------------------------------
# Encoder kernel (Single_Bert stand-in), R rows per grid step:
#   in-kernel embedding lookup via masked one-hot counts + ONE MXU matmul,
#   masked mean pool + tanh pooler.
# ----------------------------------------------------------------------------
def encoder_kernel(ids_ref, mask_ref, type_ref, emb_ref, temb_ref, w_ref, b_ref,
                   out_ref):
    ids = ids_ref[...]                                   # [R, L] int32
    mask = mask_ref[...]                                 # [R, L] f32 (0/1)
    tok = type_ref[...].astype(jnp.float32)              # [R, L]
    v = emb_ref.shape[0]

    # sum_l mask_l * emb[id_l]  ==  counts @ emb_table  (one [R,V]x[V,H] matmul)
    ids_m = jnp.where(mask > 0.0, ids, v)                # masked tokens -> no bucket
    iota_v = lax.broadcasted_iota(jnp.int32, (1, 1, v), 2)
    onehot = (ids_m[:, :, None] == iota_v).astype(jnp.float32)   # [R, L, V]
    counts = jnp.sum(onehot, axis=1)                     # [R, V] (small exact ints)
    summed_word = jnp.dot(counts.astype(jnp.bfloat16), emb_ref[...],
                          preferred_element_type=jnp.float32)    # [R, H]

    nz = jnp.sum(mask, axis=1, keepdims=True)            # [R, 1] token count
    n1 = jnp.sum(mask * tok, axis=1, keepdims=True)      # [R, 1] type-1 count
    n0 = nz - n1
    te = temb_ref[...]                                   # [2, H]
    summed_type = n0 * te[0:1, :] + n1 * te[1:2, :]      # [R, H]

    inv = pl.reciprocal(jnp.maximum(nz, 1.0), approx=True)
    pooled = (summed_word + summed_type) * inv           # [R, H] masked mean
    out_ref[...] = jnp.tanh(
        jnp.dot(pooled.astype(jnp.bfloat16), w_ref[...],
                preferred_element_type=jnp.float32) + b_ref[...]
    )


def encode_rows(ids_rows, mask_rows, type_rows, params, rows_per_block=128):
    """Encode token rows -> pooled [N, H] vectors (single pipelined pallas_call)."""
    n, seq_len = ids_rows.shape
    r = min(rows_per_block, _round_up(n, 8))             # big blocks, but no waste
    n_pad = _round_up(n, r)
    pad = n_pad - n
    if pad:
        ids_rows = jnp.pad(ids_rows, ((0, pad), (0, 0)))
        mask_rows = jnp.pad(mask_rows, ((0, pad), (0, 0)))
        type_rows = jnp.pad(type_rows, ((0, pad), (0, 0)))
    maskf = mask_rows.astype(jnp.float32)                # [n_pad, L] lane-dense
    emb = params["emb"]                                  # [V_pad, H] bf16
    temb = params["type_emb"]                            # [2, H]
    v_pad, hid = emb.shape

    # NOTE: for real BERT seq lengths (L=512) and large r, size the [R,L,V]
    # one-hot intermediate against the 64 MiB v7x VMEM budget (halve r or set
    # vmem_limit_bytes).  At these shapes the default limit is ample.
    out = pl.pallas_call(
        encoder_kernel,
        out_shape=jax.ShapeDtypeStruct((n_pad, hid), jnp.float32),
        grid=(n_pad // r,),
        in_specs=[
            pl.BlockSpec((r, seq_len), lambda i: (i, 0)),      # ids
            pl.BlockSpec((r, seq_len), lambda i: (i, 0)),      # mask
            pl.BlockSpec((r, seq_len), lambda i: (i, 0)),      # token types
            pl.BlockSpec((v_pad, hid), lambda i: (0, 0)),      # emb table (invariant)
            pl.BlockSpec((2, hid), lambda i: (0, 0)),          # type emb
            pl.BlockSpec((hid, hid), lambda i: (0, 0)),        # pooler W
            pl.BlockSpec((1, hid), lambda i: (0, 0)),          # pooler b
        ],
        out_specs=pl.BlockSpec((r, hid), lambda i: (i, 0)),
        compiler_params=pltpu.CompilerParams(dimension_semantics=("parallel",)),
    )(ids_rows.astype(jnp.int32), maskf, type_rows.astype(jnp.int32),
      emb, temb, params["w_pool"], params["b_pool"])
    return out[:n]                                        # [N, H]


# ----------------------------------------------------------------------------
# Ranker_GEAR main kernel, `bb` batch rows per grid step (batch-sharded grid):
#   relu-mean -> softmax over evidences -> top-K2 scatter mask ->
#   evidence re-weighting -> claim-conditioned attention pooling (GEAR 'att') ->
#   linear classifier + log_softmax.  Everything E-wise is lane-dense [bb, E].
# ----------------------------------------------------------------------------
def ranker_kernel(pair_ref, claim_ref, w1a_ref, w1b_ref, b1_ref, w2_ref, b2_ref,
                  wc_ref, bc_ref, sims_ref, logits_ref, *, top_k2):
    bb, e, h = pair_ref.shape
    pair = pair_ref[...]                                  # [bb, E, H] f32
    claim = claim_ref[...]                                # [bb, H]    f32

    # relu(pair).mean(dim=2) -> [bb, E] (E on lanes)
    rm = jnp.mean(jnp.maximum(pair, 0.0), axis=2)

    # softmax over evidences (lane reduce)
    mx = jnp.max(rm, axis=1, keepdims=True)
    ex = jnp.exp(rm - mx)
    sims = ex * pl.reciprocal(jnp.sum(ex, axis=1, keepdims=True), approx=True)
    sims_ref[...] = sims                                  # lane-dense slab store

    # top-K2 (largest) + scatter back -> masked_cos (static small loop, [bb,E])
    iota = lax.broadcasted_iota(jnp.int32, (bb, e), 1)
    selected = jnp.zeros((bb, e), jnp.bool_)
    masked = jnp.zeros((bb, e), jnp.float32)
    for _ in range(top_k2):
        cur = jnp.where(selected, -jnp.inf, sims)
        cmax = jnp.max(cur, axis=1, keepdims=True)
        is_max = cur == cmax
        first_idx = jnp.min(jnp.where(is_max, iota, e), axis=1, keepdims=True)
        onehot = iota == first_idx
        selected = jnp.logical_or(selected, onehot)
        masked = masked + jnp.where(onehot, sims, 0.0)

    ev = pair * masked[:, :, None]                        # [bb, E, H]
    ev_flat = ev.reshape(bb * e, h)                       # [bb*E, H]

    # GEAR (pool='att'): attention over evidences conditioned on the claim.
    h_ev = jnp.dot(ev_flat.astype(jnp.bfloat16), w1b_ref[...],
                   preferred_element_type=jnp.float32)    # [bb*E, 64]
    h_cl = jnp.dot(claim.astype(jnp.bfloat16), w1a_ref[...],
                   preferred_element_type=jnp.float32)    # [bb, 64]
    h1 = jnp.maximum(
        h_ev.reshape(bb, e, h_ev.shape[-1]) + h_cl[:, None, :] + b1_ref[...],
        0.0,
    )                                                     # [bb, E, 64]
    # score = h1 . w2  as a VPU multiply + lane reduce (w2 passed as [1, 64])
    scores = jnp.sum(h1 * w2_ref[...], axis=-1) + b2_ref[...]     # [bb, E]
    smx = jnp.max(scores, axis=1, keepdims=True)
    sw = jnp.exp(scores - smx)
    attw = sw * pl.reciprocal(jnp.sum(sw, axis=1, keepdims=True), approx=True)
    pooled = jnp.sum(ev * attw[:, :, None], axis=1)       # [bb, H]

    # classifier + log_softmax -> one [bb,H]x[H,3] matmul
    lin = jnp.dot(pooled.astype(jnp.bfloat16), wc_ref[...],
                  preferred_element_type=jnp.float32) + bc_ref[...]   # [bb, 3]
    lmx = jnp.max(lin, axis=1, keepdims=True)
    lse = jnp.log(jnp.sum(jnp.exp(lin - lmx), axis=1, keepdims=True)) + lmx
    logits_ref[...] = lin - lse


def run_ranker(pair_vector, claim_first, params, top_k2, batch_block=8):
    b, e, h = pair_vector.shape
    assert 0 < top_k2 <= e, "top_k2 must be in (0, evidences_num]"
    bb = min(batch_block, _round_up(b, 8))                # sublane-friendly tile
    b_pad = _round_up(b, bb)
    if b_pad != b:
        pair_vector = jnp.pad(pair_vector, ((0, b_pad - b), (0, 0), (0, 0)))
        claim_first = jnp.pad(claim_first, ((0, b_pad - b), (0, 0)))
    d1 = params["w1a"].shape[1]

    kern = functools.partial(ranker_kernel, top_k2=top_k2)
    sims, logits = pl.pallas_call(
        kern,
        out_shape=(
            jax.ShapeDtypeStruct((b_pad, e), jnp.float32),
            jax.ShapeDtypeStruct((b_pad, 3), jnp.float32),
        ),
        grid=(b_pad // bb,),
        in_specs=[
            pl.BlockSpec((bb, e, h), lambda i: (i, 0, 0)),     # pair_vector
            pl.BlockSpec((bb, h), lambda i: (i, 0)),           # claim
            pl.BlockSpec((h, d1), lambda i: (0, 0)),           # w1a
            pl.BlockSpec((h, d1), lambda i: (0, 0)),           # w1b
            pl.BlockSpec((1, d1), lambda i: (0, 0)),           # b1
            pl.BlockSpec((1, d1), lambda i: (0, 0)),           # w2 (row)
            pl.BlockSpec((1, 1), lambda i: (0, 0)),            # b2
            pl.BlockSpec((h, 3), lambda i: (0, 0)),            # wc
            pl.BlockSpec((1, 3), lambda i: (0, 0)),            # bc
        ],
        out_specs=(
            pl.BlockSpec((bb, e), lambda i: (i, 0)),
            pl.BlockSpec((bb, 3), lambda i: (i, 0)),
        ),
        compiler_params=pltpu.CompilerParams(dimension_semantics=("parallel",)),
    )(
        pair_vector, claim_first,
        params["w1a"], params["w1b"], params["b1"],
        params["w2_row"], params["b2"],
        params["wc"], params["bc"],
    )
    return sims[:b], logits[:b]


# ----------------------------------------------------------------------------
# Full Ranker_GEAR.forward
# ----------------------------------------------------------------------------
def ranker_gear_forward(ids, masks, token_ids, params, batchsize, evidences_num,
                        top_k2):
    ids_pair = concat_jax(ids[0], ids[1])
    masks_pair = concat_jax(masks[0], masks[1])
    token_ids_pair = concat_jax(token_ids[0], token_ids[1])

    # Only claim_vector[:, 0] is consumed downstream -> encode just the B
    # unique claim rows (rows 0, E, 2E, ...) instead of all B*E.
    sel = jnp.arange(batchsize, dtype=jnp.int32) * evidences_num
    ids_claim = ids[0][sel]
    masks_claim = masks[0][sel]
    token_claim = token_ids[0][sel]

    # Fuse pair-encode and claim-encode into one pallas_call (one pipeline,
    # tables/pooler weights DMA'd once).
    ids_all = jnp.concatenate([ids_pair, ids_claim], axis=0)
    masks_all = jnp.concatenate([masks_pair, masks_claim], axis=0)
    token_all = jnp.concatenate([token_ids_pair, token_claim], axis=0)

    enc = encode_rows(ids_all, masks_all, token_all, params)      # [B*E + B, H]
    hid = enc.shape[-1]
    n_pair = batchsize * evidences_num
    pair_vector = enc[:n_pair].reshape(batchsize, evidences_num, hid)
    claim_first = enc[n_pair:n_pair + batchsize]                  # [B, H]

    pair_sims, logits = run_ranker(pair_vector, claim_first, params, top_k2)
    return pair_sims, logits


if __name__ == "__main__":
    # small, module-consistent shapes
    B = 2            # batchsize
    E = 8            # evidences_num == args.TOP_K1 (nins)
    L = 16           # sequence length
    H = 128          # args.dimension (nfeat); lane-friendly
    TOP_K2 = 3
    VOCAB = 97

    key = jax.random.PRNGKey(0)
    ks = jax.random.split(key, 12)

    raw_params = {
        "emb": jax.random.normal(ks[0], (VOCAB, H), jnp.float32) * 0.02,
        "type_emb": jax.random.normal(ks[1], (2, H), jnp.float32) * 0.02,
        "w_pool": jax.random.normal(ks[2], (H, H), jnp.float32) * 0.05,
        "b_pool": jnp.zeros((1, H), jnp.float32),
        "w1a": jax.random.normal(ks[3], (H, 64), jnp.float32) * 0.05,
        "w1b": jax.random.normal(ks[4], (H, 64), jnp.float32) * 0.05,
        "b1": jnp.zeros((1, 64), jnp.float32),
        "w2": jax.random.normal(ks[5], (64, 1), jnp.float32) * 0.05,
        "b2": jnp.zeros((1, 1), jnp.float32),
        "wc": jax.random.normal(ks[6], (H, 3), jnp.float32) * 0.05,
        "bc": jnp.zeros((1, 3), jnp.float32),
    }
    params = prepare_params(raw_params, VOCAB, H)   # one-time bf16 casts / padding

    N = B * E
    pos = jnp.arange(L, dtype=jnp.int32)[None, :]
    claim_len = jax.random.randint(ks[7], (N, 1), 3, 9)
    ev_len = jax.random.randint(ks[8], (N, 1), 4, 13)
    claim_ids = jnp.where(pos < claim_len,
                          jax.random.randint(ks[9], (N, L), 1, VOCAB), 0).astype(jnp.int32)
    ev_ids = jnp.where(pos < ev_len,
                       jax.random.randint(ks[10], (N, L), 1, VOCAB), 0).astype(jnp.int32)

    ids = jnp.stack([claim_ids, ev_ids])                     # [2, B*E, L]
    masks = (ids != 0).astype(jnp.int32)                     # [2, B*E, L]
    token_ids = jnp.stack([jnp.zeros((N, L), jnp.int32),
                           jnp.ones((N, L), jnp.int32)])     # [2, B*E, L]

    forward = jax.jit(ranker_gear_forward,
                      static_argnames=("batchsize", "evidences_num", "top_k2"))
    pair_sims, logits = forward(ids, masks, token_ids, params,
                                batchsize=B, evidences_num=E, top_k2=TOP_K2)
    jax.block_until_ready((pair_sims, logits))

    assert pair_sims.shape == (B, E)
    assert logits.shape == (B, 3)
    assert bool(jnp.all(jnp.isfinite(pair_sims)))
    assert bool(jnp.all(jnp.isfinite(logits)))
    print("KERNEL_OK")
</pallas_src>

<mosaic_0001>
module attributes {stable_mosaic.version = 11 : i64} {
  func.func @encoder_kernel(%arg0: i32, %arg1: memref<24x16xi32, #tpu.memory_space<vmem>>, %arg2: memref<24x16xf32, #tpu.memory_space<vmem>>, %arg3: memref<24x16xi32, #tpu.memory_space<vmem>>, %arg4: memref<128x128xbf16, #tpu.memory_space<vmem>>, %arg5: memref<2x128xf32, #tpu.memory_space<vmem>>, %arg6: memref<128x128xbf16, #tpu.memory_space<vmem>>, %arg7: memref<1x128xf32, #tpu.memory_space<vmem>>, %arg8: memref<24x128xf32, #tpu.memory_space<vmem>>) attributes {dimension_semantics = [#tpu.dimension_semantics<parallel>], iteration_bounds = array<i64: 1>, scalar_prefetch = 0 : i64, scratch_operands = 0 : i64, tpu.core_type = #tpu.core_type<tc>, window_params = [{transform_indices = @transform_0, window_bounds = array<i64: 24, 16>}, {transform_indices = @transform_1, window_bounds = array<i64: 24, 16>}, {transform_indices = @transform_2, window_bounds = array<i64: 24, 16>}, {pipeline_mode = #tpu.pipeline_mode<synchronous>, transform_indices = @transform_3, window_bounds = array<i64: 128, 128>}, {pipeline_mode = #tpu.pipeline_mode<synchronous>, transform_indices = @transform_4, window_bounds = array<i64: 2, 128>}, {pipeline_mode = #tpu.pipeline_mode<synchronous>, transform_indices = @transform_5, window_bounds = array<i64: 128, 128>}, {pipeline_mode = #tpu.pipeline_mode<synchronous>, transform_indices = @transform_6, window_bounds = array<i64: 1, 128>}, {transform_indices = @transform_7, window_bounds = array<i64: 24, 128>}]} {
    %c0 = arith.constant 0 : index
    %c0_0 = arith.constant 0 : index
    %0 = vector.load %arg1[%c0, %c0_0] : memref<24x16xi32, #tpu.memory_space<vmem>>, vector<24x16xi32>
    %c0_1 = arith.constant 0 : index
    %c0_2 = arith.constant 0 : index
    %1 = vector.load %arg2[%c0_1, %c0_2] : memref<24x16xf32, #tpu.memory_space<vmem>>, vector<24x16xf32>
    %c0_3 = arith.constant 0 : index
    %c0_4 = arith.constant 0 : index
    %2 = vector.load %arg3[%c0_3, %c0_4] : memref<24x16xi32, #tpu.memory_space<vmem>>, vector<24x16xi32>
    %3 = arith.sitofp %2 : vector<24x16xi32> to vector<24x16xf32>
    %cst = arith.constant 0.000000e+00 : f32
    %4 = vector.broadcast %cst : f32 to vector<24x16xf32>
    %5 = arith.cmpf ogt, %1, %4 : vector<24x16xf32>
    %c128_i32 = arith.constant 128 : i32
    %6 = vector.broadcast %c128_i32 : i32 to vector<24x16xi32>
    %7 = arith.select %5, %0, %6 : vector<24x16xi1>, vector<24x16xi32>
    %8 = tpu.iota {dimensions = array<i32: 2>} : vector<1x1x128xi32>
    %9 = vector.shape_cast %7 : vector<24x16xi32> to vector<24x16x1xi32>
    %10 = vector.broadcast %9 : vector<24x16x1xi32> to vector<24x16x128xi32>
    %11 = vector.broadcast %8 : vector<1x1x128xi32> to vector<24x16x128xi32>
    %12 = arith.cmpi eq, %10, %11 : vector<24x16x128xi32>
    %13 = arith.extui %12 : vector<24x16x128xi1> to vector<24x16x128xi32>
    %14 = arith.sitofp %13 : vector<24x16x128xi32> to vector<24x16x128xf32>
    %cst_5 = arith.constant dense<0.000000e+00> : vector<24x128xf32>
    %15 = vector.multi_reduction <add>, %14, %cst_5 [1] : vector<24x16x128xf32> to vector<24x128xf32>
    %16 = arith.truncf %15 : vector<24x128xf32> to vector<24x128xbf16>
    %c0_6 = arith.constant 0 : index
    %c0_7 = arith.constant 0 : index
    %17 = vector.load %arg4[%c0_6, %c0_7] : memref<128x128xbf16, #tpu.memory_space<vmem>>, vector<128x128xbf16>
    %cst_8 = arith.constant dense<0.000000e+00> : vector<24x128xf32>
    %18 = tpu.matmul %16, %17, %cst_8 {dimension_numbers = #tpu.dot_dimension_numbers<[1], [0], [0], [1], [0, 0, 1, 1], [], []>} : vector<24x128xbf16>, vector<128x128xbf16>, vector<24x128xf32> -> vector<24x128xf32>
    %cst_9 = arith.constant dense<0.000000e+00> : vector<24xf32>
    %19 = vector.multi_reduction <add>, %1, %cst_9 [1] : vector<24x16xf32> to vector<24xf32>
    %20 = vector.shape_cast %19 : vector<24xf32> to vector<24x1xf32>
    %21 = arith.mulf %1, %3 : vector<24x16xf32>
    %cst_10 = arith.constant dense<0.000000e+00> : vector<24xf32>
    %22 = vector.multi_reduction <add>, %21, %cst_10 [1] : vector<24x16xf32> to vector<24xf32>
    %23 = vector.shape_cast %22 : vector<24xf32> to vector<24x1xf32>
    %24 = arith.subf %20, %23 : vector<24x1xf32>
    %c0_11 = arith.constant 0 : index
    %c0_12 = arith.constant 0 : index
    %25 = vector.load %arg5[%c0_11, %c0_12] : memref<2x128xf32, #tpu.memory_space<vmem>>, vector<2x128xf32>
    %26 = vector.extract_strided_slice %25 {offsets = [0, 0], sizes = [1, 128], strides = [1, 1]} : vector<2x128xf32> to vector<1x128xf32>
    %27 = vector.broadcast %24 : vector<24x1xf32> to vector<24x128xf32>
    %28 = vector.broadcast %26 : vector<1x128xf32> to vector<24x128xf32>
    %29 = arith.mulf %27, %28 : vector<24x128xf32>
    %30 = vector.extract_strided_slice %25 {offsets = [1, 0], sizes = [1, 128], strides = [1, 1]} : vector<2x128xf32> to vector<1x128xf32>
    %31 = vector.broadcast %23 : vector<24x1xf32> to vector<24x128xf32>
    %32 = vector.broadcast %30 : vector<1x128xf32> to vector<24x128xf32>
    %33 = arith.mulf %31, %32 : vector<24x128xf32>
    %34 = arith.addf %29, %33 : vector<24x128xf32>
    %cst_13 = arith.constant 1.000000e+00 : f32
    %35 = vector.broadcast %cst_13 : f32 to vector<24x1xf32>
    %36 = arith.maximumf %20, %35 : vector<24x1xf32>
    %37 = tpu.reciprocal %36 {approx = true} : vector<24x1xf32> -> vector<24x1xf32>
    %38 = arith.addf %18, %34 : vector<24x128xf32>
    %39 = vector.broadcast %37 : vector<24x1xf32> to vector<24x128xf32>
    %40 = arith.mulf %38, %39 : vector<24x128xf32>
    %41 = arith.truncf %40 : vector<24x128xf32> to vector<24x128xbf16>
    %c0_14 = arith.constant 0 : index
    %c0_15 = arith.constant 0 : index
    %42 = vector.load %arg6[%c0_14, %c0_15] : memref<128x128xbf16, #tpu.memory_space<vmem>>, vector<128x128xbf16>
    %cst_16 = arith.constant dense<0.000000e+00> : vector<24x128xf32>
    %43 = tpu.matmul %41, %42, %cst_16 {dimension_numbers = #tpu.dot_dimension_numbers<[1], [0], [0], [1], [0, 0, 1, 1], [], []>} : vector<24x128xbf16>, vector<128x128xbf16>, vector<24x128xf32> -> vector<24x128xf32>
    %c0_17 = arith.constant 0 : index
    %c0_18 = arith.constant 0 : index
    %44 = vector.load %arg7[%c0_17, %c0_18] : memref<1x128xf32, #tpu.memory_space<vmem>>, vector<1x128xf32>
    %45 = vector.broadcast %44 : vector<1x128xf32> to vector<24x128xf32>
    %46 = arith.addf %43, %45 : vector<24x128xf32>
    %47 = math.tanh %46 : vector<24x128xf32>
    %c0_19 = arith.constant 0 : index
    %c0_20 = arith.constant 0 : index
    %48 = vector.load %arg8[%c0_19, %c0_20] : memref<24x128xf32, #tpu.memory_space<vmem>>, vector<24x128xf32>
    tpu.vector_store %arg8[%c0_19, %c0_20], %47 {strides = array<i32>} : memref<24x128xf32, #tpu.memory_space<vmem>>, vector<24x128xf32>,
    return
  }
  func.func @transform_0(%arg0: i32) -> (i32, i32) {
    %c0_i32 = arith.constant 0 : i32
    %c0_i32_0 = arith.constant 0 : i32
    return %arg0, %c0_i32 : i32, i32
  }
  func.func @transform_1(%arg0: i32) -> (i32, i32) {
    %c0_i32 = arith.constant 0 : i32
    %c0_i32_0 = arith.constant 0 : i32
    return %arg0, %c0_i32 : i32, i32
  }
  func.func @transform_2(%arg0: i32) -> (i32, i32) {
    %c0_i32 = arith.constant 0 : i32
    %c0_i32_0 = arith.constant 0 : i32
    return %arg0, %c0_i32 : i32, i32
  }
  func.func @transform_3(%arg0: i32) -> (i32, i32) {
    %c0_i32 = arith.constant 0 : i32
    %c0_i32_0 = arith.constant 0 : i32
    %c0_i32_1 = arith.constant 0 : i32
    return %c0_i32, %c0_i32_0 : i32, i32
  }
  func.func @transform_4(%arg0: i32) -> (i32, i32) {
    %c0_i32 = arith.constant 0 : i32
    %c0_i32_0 = arith.constant 0 : i32
    %c0_i32_1 = arith.constant 0 : i32
    return %c0_i32, %c0_i32_0 : i32, i32
  }
  func.func @transform_5(%arg0: i32) -> (i32, i32) {
    %c0_i32 = arith.constant 0 : i32
    %c0_i32_0 = arith.constant 0 : i32
    %c0_i32_1 = arith.constant 0 : i32
    return %c0_i32, %c0_i32_0 : i32, i32
  }
  func.func @transform_6(%arg0: i32) -> (i32, i32) {
    %c0_i32 = arith.constant 0 : i32
    %c0_i32_0 = arith.constant 0 : i32
    %c0_i32_1 = arith.constant 0 : i32
    return %c0_i32, %c0_i32_0 : i32, i32
  }
  func.func @transform_7(%arg0: i32) -> (i32, i32) {
    %c0_i32 = arith.constant 0 : i32
    %c0_i32_0 = arith.constant 0 : i32
    return %arg0, %c0_i32 : i32, i32
  }
}

module attributes {stable_mosaic.version = 11 : i64} {
  func.func @ranker_kernel(%arg0: i32, %arg1: memref<8x8x128xf32, #tpu.memory_space<vmem>>, %arg2: memref<8x128xf32, #tpu.memory_space<vmem>>, %arg3: memref<128x64xbf16, #tpu.memory_space<vmem>>, %arg4: memref<128x64xbf16, #tpu.memory_space<vmem>>, %arg5: memref<1x64xf32, #tpu.memory_space<vmem>>, %arg6: memref<1x64xf32, #tpu.memory_space<vmem>>, %arg7: memref<1x1xf32, #tpu.memory_space<vmem>>, %arg8: memref<128x3xbf16, #tpu.memory_space<vmem>>, %arg9: memref<1x3xf32, #tpu.memory_space<vmem>>, %arg10: memref<8x8xf32, #tpu.memory_space<vmem>>, %arg11: memref<8x3xf32, #tpu.memory_space<vmem>>) attributes {dimension_semantics = [#tpu.dimension_semantics<parallel>], iteration_bounds = array<i64: 1>, scalar_prefetch = 0 : i64, scratch_operands = 0 : i64, tpu.core_type = #tpu.core_type<tc>, window_params = [{transform_indices = @transform_0, window_bounds = array<i64: 8, 8, 128>}, {transform_indices = @transform_1, window_bounds = array<i64: 8, 128>}, {pipeline_mode = #tpu.pipeline_mode<synchronous>, transform_indices = @transform_2, window_bounds = array<i64: 128, 64>}, {pipeline_mode = #tpu.pipeline_mode<synchronous>, transform_indices = @transform_3, window_bounds = array<i64: 128, 64>}, {pipeline_mode = #tpu.pipeline_mode<synchronous>, transform_indices = @transform_4, window_bounds = array<i64: 1, 64>}, {pipeline_mode = #tpu.pipeline_mode<synchronous>, transform_indices = @transform_5, window_bounds = array<i64: 1, 64>}, {pipeline_mode = #tpu.pipeline_mode<synchronous>, transform_indices = @transform_6, window_bounds = array<i64: 1, 1>}, {pipeline_mode = #tpu.pipeline_mode<synchronous>, transform_indices = @transform_7, window_bounds = array<i64: 128, 3>}, {pipeline_mode = #tpu.pipeline_mode<synchronous>, transform_indices = @transform_8, window_bounds = array<i64: 1, 3>}, {transform_indices = @transform_9, window_bounds = array<i64: 8, 8>}, {transform_indices = @transform_10, window_bounds = array<i64: 8, 3>}]} {
    %c0 = arith.constant 0 : index
    %c0_0 = arith.constant 0 : index
    %c0_1 = arith.constant 0 : index
    %0 = vector.load %arg1[%c0, %c0_0, %c0_1] : memref<8x8x128xf32, #tpu.memory_space<vmem>>, vector<8x8x128xf32>
    %c0_2 = arith.constant 0 : index
    %c0_3 = arith.constant 0 : index
    %1 = vector.load %arg2[%c0_2, %c0_3] : memref<8x128xf32, #tpu.memory_space<vmem>>, vector<8x128xf32>
    %cst = arith.constant 0.000000e+00 : f32
    %2 = vector.broadcast %cst : f32 to vector<8x8x128xf32>
    %3 = arith.maximumf %0, %2 : vector<8x8x128xf32>
    %cst_4 = arith.constant dense<0.000000e+00> : vector<8x8xf32>
    %4 = vector.multi_reduction <add>, %3, %cst_4 [2] : vector<8x8x128xf32> to vector<8x8xf32>
    %cst_5 = arith.constant 1.280000e+02 : f32
    %5 = vector.broadcast %cst_5 : f32 to vector<8x8xf32>
    %6 = arith.divf %4, %5 : vector<8x8xf32>
    %cst_6 = arith.constant dense<0xFF800000> : vector<8xf32>
    %7 = vector.multi_reduction <maximumf>, %6, %cst_6 [1] : vector<8x8xf32> to vector<8xf32>
    %8 = vector.shape_cast %7 : vector<8xf32> to vector<8x1xf32>
    %9 = vector.broadcast %8 : vector<8x1xf32> to vector<8x8xf32>
    %10 = arith.subf %6, %9 : vector<8x8xf32>
    %11 = math.exp %10 : vector<8x8xf32>
    %cst_7 = arith.constant dense<0.000000e+00> : vector<8xf32>
    %12 = vector.multi_reduction <add>, %11, %cst_7 [1] : vector<8x8xf32> to vector<8xf32>
    %13 = vector.shape_cast %12 : vector<8xf32> to vector<8x1xf32>
    %14 = tpu.reciprocal %13 {approx = true} : vector<8x1xf32> -> vector<8x1xf32>
    %15 = vector.broadcast %14 : vector<8x1xf32> to vector<8x8xf32>
    %16 = arith.mulf %11, %15 : vector<8x8xf32>
    %c0_8 = arith.constant 0 : index
    %c0_9 = arith.constant 0 : index
    %17 = vector.load %arg10[%c0_8, %c0_9] : memref<8x8xf32, #tpu.memory_space<vmem>>, vector<8x8xf32>
    tpu.vector_store %arg10[%c0_8, %c0_9], %16 {strides = array<i32>} : memref<8x8xf32, #tpu.memory_space<vmem>>, vector<8x8xf32>,
    %18 = tpu.iota {dimensions = array<i32: 1>} : vector<8x8xi32>
    %false = arith.constant false
    %19 = vector.broadcast %false : i1 to vector<8x8xi1>
    %cst_10 = arith.constant 0.000000e+00 : f32
    %20 = vector.broadcast %cst_10 : f32 to vector<8x8xf32>
    %cst_11 = arith.constant 0xFF800000 : f32
    %21 = vector.broadcast %cst_11 : f32 to vector<8x8xf32>
    %22 = arith.select %19, %21, %16 : vector<8x8xi1>, vector<8x8xf32>
    %cst_12 = arith.constant dense<0xFF800000> : vector<8xf32>
    %23 = vector.multi_reduction <maximumf>, %22, %cst_12 [1] : vector<8x8xf32> to vector<8xf32>
    %24 = vector.shape_cast %23 : vector<8xf32> to vector<8x1xf32>
    %25 = vector.broadcast %24 : vector<8x1xf32> to vector<8x8xf32>
    %26 = arith.cmpf oeq, %22, %25 : vector<8x8xf32>
    %c8_i32 = arith.constant 8 : i32
    %27 = vector.broadcast %c8_i32 : i32 to vector<8x8xi32>
    %28 = arith.select %26, %18, %27 : vector<8x8xi1>, vector<8x8xi32>
    %cst_13 = arith.constant dense<2147483647> : vector<8xi32>
    %29 = vector.multi_reduction <minsi>, %28, %cst_13 [1] : vector<8x8xi32> to vector<8xi32>
    %30 = vector.shape_cast %29 : vector<8xi32> to vector<8x1xi32>
    %31 = vector.broadcast %30 : vector<8x1xi32> to vector<8x8xi32>
    %32 = arith.cmpi eq, %18, %31 : vector<8x8xi32>
    %33 = arith.ori %19, %32 : vector<8x8xi1>
    %cst_14 = arith.constant 0.000000e+00 : f32
    %34 = vector.broadcast %cst_14 : f32 to vector<8x8xf32>
    %35 = arith.select %32, %16, %34 : vector<8x8xi1>, vector<8x8xf32>
    %36 = arith.addf %20, %35 : vector<8x8xf32>
    %cst_15 = arith.constant 0xFF800000 : f32
    %37 = vector.broadcast %cst_15 : f32 to vector<8x8xf32>
    %38 = arith.select %33, %37, %16 : vector<8x8xi1>, vector<8x8xf32>
    %cst_16 = arith.constant dense<0xFF800000> : vector<8xf32>
    %39 = vector.multi_reduction <maximumf>, %38, %cst_16 [1] : vector<8x8xf32> to vector<8xf32>
    %40 = vector.shape_cast %39 : vector<8xf32> to vector<8x1xf32>
    %41 = vector.broadcast %40 : vector<8x1xf32> to vector<8x8xf32>
    %42 = arith.cmpf oeq, %38, %41 : vector<8x8xf32>
    %c8_i32_17 = arith.constant 8 : i32
    %43 = vector.broadcast %c8_i32_17 : i32 to vector<8x8xi32>
    %44 = arith.select %42, %18, %43 : vector<8x8xi1>, vector<8x8xi32>
    %cst_18 = arith.constant dense<2147483647> : vector<8xi32>
    %45 = vector.multi_reduction <minsi>, %44, %cst_18 [1] : vector<8x8xi32> to vector<8xi32>
    %46 = vector.shape_cast %45 : vector<8xi32> to vector<8x1xi32>
    %47 = vector.broadcast %46 : vector<8x1xi32> to vector<8x8xi32>
    %48 = arith.cmpi eq, %18, %47 : vector<8x8xi32>
    %49 = arith.ori %33, %48 : vector<8x8xi1>
    %cst_19 = arith.constant 0.000000e+00 : f32
    %50 = vector.broadcast %cst_19 : f32 to vector<8x8xf32>
    %51 = arith.select %48, %16, %50 : vector<8x8xi1>, vector<8x8xf32>
    %52 = arith.addf %36, %51 : vector<8x8xf32>
    %cst_20 = arith.constant 0xFF800000 : f32
    %53 = vector.broadcast %cst_20 : f32 to vector<8x8xf32>
    %54 = arith.select %49, %53, %16 : vector<8x8xi1>, vector<8x8xf32>
    %cst_21 = arith.constant dense<0xFF800000> : vector<8xf32>
    %55 = vector.multi_reduction <maximumf>, %54, %cst_21 [1] : vector<8x8xf32> to vector<8xf32>
    %56 = vector.shape_cast %55 : vector<8xf32> to vector<8x1xf32>
    %57 = vector.broadcast %56 : vector<8x1xf32> to vector<8x8xf32>
    %58 = arith.cmpf oeq, %54, %57 : vector<8x8xf32>
    %c8_i32_22 = arith.constant 8 : i32
    %59 = vector.broadcast %c8_i32_22 : i32 to vector<8x8xi32>
    %60 = arith.select %58, %18, %59 : vector<8x8xi1>, vector<8x8xi32>
    %cst_23 = arith.constant dense<2147483647> : vector<8xi32>
    %61 = vector.multi_reduction <minsi>, %60, %cst_23 [1] : vector<8x8xi32> to vector<8xi32>
    %62 = vector.shape_cast %61 : vector<8xi32> to vector<8x1xi32>
    %63 = vector.broadcast %62 : vector<8x1xi32> to vector<8x8xi32>
    %64 = arith.cmpi eq, %18, %63 : vector<8x8xi32>
    %cst_24 = arith.constant 0.000000e+00 : f32
    %65 = vector.broadcast %cst_24 : f32 to vector<8x8xf32>
    %66 = arith.select %64, %16, %65 : vector<8x8xi1>, vector<8x8xf32>
    %67 = arith.addf %52, %66 : vector<8x8xf32>
    %68 = vector.shape_cast %67 : vector<8x8xf32> to vector<8x8x1xf32>
    %69 = vector.broadcast %68 : vector<8x8x1xf32> to vector<8x8x128xf32>
    %70 = arith.mulf %0, %69 : vector<8x8x128xf32>
    %71 = vector.shape_cast %70 : vector<8x8x128xf32> to vector<64x128xf32>
    %72 = arith.truncf %71 : vector<64x128xf32> to vector<64x128xbf16>
    %c0_25 = arith.constant 0 : index
    %c0_26 = arith.constant 0 : index
    %73 = vector.load %arg4[%c0_25, %c0_26] : memref<128x64xbf16, #tpu.memory_space<vmem>>, vector<128x64xbf16>
    %cst_27 = arith.constant dense<0.000000e+00> : vector<64x64xf32>
    %74 = tpu.matmul %72, %73, %cst_27 {dimension_numbers = #tpu.dot_dimension_numbers<[1], [0], [0], [1], [0, 0, 1, 1], [], []>} : vector<64x128xbf16>, vector<128x64xbf16>, vector<64x64xf32> -> vector<64x64xf32>
    %75 = arith.truncf %1 : vector<8x128xf32> to vector<8x128xbf16>
    %c0_28 = arith.constant 0 : index
    %c0_29 = arith.constant 0 : index
    %76 = vector.load %arg3[%c0_28, %c0_29] : memref<128x64xbf16, #tpu.memory_space<vmem>>, vector<128x64xbf16>
    %cst_30 = arith.constant dense<0.000000e+00> : vector<8x64xf32>
    %77 = tpu.matmul %75, %76, %cst_30 {dimension_numbers = #tpu.dot_dimension_numbers<[1], [0], [0], [1], [0, 0, 1, 1], [], []>} : vector<8x128xbf16>, vector<128x64xbf16>, vector<8x64xf32> -> vector<8x64xf32>
    %78 = vector.shape_cast %74 : vector<64x64xf32> to vector<8x8x64xf32>
    %79 = vector.shape_cast %77 : vector<8x64xf32> to vector<8x1x64xf32>
    %80 = vector.broadcast %79 : vector<8x1x64xf32> to vector<8x8x64xf32>
    %81 = arith.addf %78, %80 : vector<8x8x64xf32>
    %c0_31 = arith.constant 0 : index
    %c0_32 = arith.constant 0 : index
    %82 = vector.load %arg5[%c0_31, %c0_32] : memref<1x64xf32, #tpu.memory_space<vmem>>, vector<1x64xf32>
    %83 = vector.shape_cast %82 : vector<1x64xf32> to vector<1x1x64xf32>
    %84 = vector.broadcast %83 : vector<1x1x64xf32> to vector<8x8x64xf32>
    %85 = arith.addf %81, %84 : vector<8x8x64xf32>
    %cst_33 = arith.constant 0.000000e+00 : f32
    %86 = vector.broadcast %cst_33 : f32 to vector<8x8x64xf32>
    %87 = arith.maximumf %85, %86 : vector<8x8x64xf32>
    %c0_34 = arith.constant 0 : index
    %c0_35 = arith.constant 0 : index
    %88 = vector.load %arg6[%c0_34, %c0_35] : memref<1x64xf32, #tpu.memory_space<vmem>>, vector<1x64xf32>
    %89 = vector.shape_cast %88 : vector<1x64xf32> to vector<1x1x64xf32>
    %90 = vector.broadcast %89 : vector<1x1x64xf32> to vector<8x8x64xf32>
    %91 = arith.mulf %87, %90 : vector<8x8x64xf32>
    %cst_36 = arith.constant dense<0.000000e+00> : vector<8x8xf32>
    %92 = vector.multi_reduction <add>, %91, %cst_36 [2] : vector<8x8x64xf32> to vector<8x8xf32>
    %c0_37 = arith.constant 0 : index
    %c0_38 = arith.constant 0 : index
    %93 = vector.load %arg7[%c0_37, %c0_38] : memref<1x1xf32, #tpu.memory_space<vmem>>, vector<1x1xf32>
    %94 = vector.broadcast %93 : vector<1x1xf32> to vector<8x8xf32>
    %95 = arith.addf %92, %94 : vector<8x8xf32>
    %cst_39 = arith.constant dense<0xFF800000> : vector<8xf32>
    %96 = vector.multi_reduction <maximumf>, %95, %cst_39 [1] : vector<8x8xf32> to vector<8xf32>
    %97 = vector.shape_cast %96 : vector<8xf32> to vector<8x1xf32>
    %98 = vector.broadcast %97 : vector<8x1xf32> to vector<8x8xf32>
    %99 = arith.subf %95, %98 : vector<8x8xf32>
    %100 = math.exp %99 : vector<8x8xf32>
    %cst_40 = arith.constant dense<0.000000e+00> : vector<8xf32>
    %101 = vector.multi_reduction <add>, %100, %cst_40 [1] : vector<8x8xf32> to vector<8xf32>
    %102 = vector.shape_cast %101 : vector<8xf32> to vector<8x1xf32>
    %103 = tpu.reciprocal %102 {approx = true} : vector<8x1xf32> -> vector<8x1xf32>
    %104 = vector.broadcast %103 : vector<8x1xf32> to vector<8x8xf32>
    %105 = arith.mulf %100, %104 : vector<8x8xf32>
    %106 = vector.shape_cast %105 : vector<8x8xf32> to vector<8x8x1xf32>
    %107 = vector.broadcast %106 : vector<8x8x1xf32> to vector<8x8x128xf32>
    %108 = arith.mulf %70, %107 : vector<8x8x128xf32>
    %cst_41 = arith.constant dense<0.000000e+00> : vector<8x128xf32>
    %109 = vector.multi_reduction <add>, %108, %cst_41 [1] : vector<8x8x128xf32> to vector<8x128xf32>
    %110 = arith.truncf %109 : vector<8x128xf32> to vector<8x128xbf16>
    %c0_42 = arith.constant 0 : index
    %c0_43 = arith.constant 0 : index
    %111 = vector.load %arg8[%c0_42, %c0_43] : memref<128x3xbf16, #tpu.memory_space<vmem>>, vector<128x3xbf16>
    %cst_44 = arith.constant dense<0.000000e+00> : vector<8x3xf32>
    %112 = tpu.matmul %110, %111, %cst_44 {dimension_numbers = #tpu.dot_dimension_numbers<[1], [0], [0], [1], [0, 0, 1, 1], [], []>} : vector<8x128xbf16>, vector<128x3xbf16>, vector<8x3xf32> -> vector<8x3xf32>
    %c0_45 = arith.constant 0 : index
    %c0_46 = arith.constant 0 : index
    %113 = vector.load %arg9[%c0_45, %c0_46] : memref<1x3xf32, #tpu.memory_space<vmem>>, vector<1x3xf32>
    %114 = vector.broadcast %113 : vector<1x3xf32> to vector<8x3xf32>
    %115 = arith.addf %112, %114 : vector<8x3xf32>
    %cst_47 = arith.constant dense<0xFF800000> : vector<8xf32>
    %116 = vector.multi_reduction <maximumf>, %115, %cst_47 [1] : vector<8x3xf32> to vector<8xf32>
    %117 = vector.shape_cast %116 : vector<8xf32> to vector<8x1xf32>
    %118 = vector.broadcast %117 : vector<8x1xf32> to vector<8x3xf32>
    %119 = arith.subf %115, %118 : vector<8x3xf32>
    %120 = math.exp %119 : vector<8x3xf32>
    %cst_48 = arith.constant dense<0.000000e+00> : vector<8xf32>
    %121 = vector.multi_reduction <add>, %120, %cst_48 [1] : vector<8x3xf32> to vector<8xf32>
    %122 = vector.shape_cast %121 : vector<8xf32> to vector<8x1xf32>
    %123 = math.log %122 : vector<8x1xf32>
    %124 = arith.addf %123, %117 : vector<8x1xf32>
    %125 = vector.broadcast %124 : vector<8x1xf32> to vector<8x3xf32>
    %126 = arith.subf %115, %125 : vector<8x3xf32>
    %c0_49 = arith.constant 0 : index
    %c0_50 = arith.constant 0 : index
    %127 = vector.load %arg11[%c0_49, %c0_50] : memref<8x3xf32, #tpu.memory_space<vmem>>, vector<8x3xf32>
    tpu.vector_store %arg11[%c0_49, %c0_50], %126 {strides = array<i32>} : memref<8x3xf32, #tpu.memory_space<vmem>>, vector<8x3xf32>,
    return
  }
  func.func @transform_0(%arg0: i32) -> (i32, i32, i32) {
    %c0_i32 = arith.constant 0 : i32
    %c0_i32_0 = arith.constant 0 : i32
    %c0_i32_1 = arith.constant 0 : i32
    return %arg0, %c0_i32, %c0_i32_0 : i32, i32, i32
  }
  func.func @transform_1(%arg0: i32) -> (i32, i32) {
    %c0_i32 = arith.constant 0 : i32
    %c0_i32_0 = arith.constant 0 : i32
    return %arg0, %c0_i32 : i32, i32
  }
  func.func @transform_2(%arg0: i32) -> (i32, i32) {
    %c0_i32 = arith.constant 0 : i32
    %c0_i32_0 = arith.constant 0 : i32
    %c0_i32_1 = arith.constant 0 : i32
    return %c0_i32, %c0_i32_0 : i32, i32
  }
  func.func @transform_3(%arg0: i32) -> (i32, i32) {
    %c0_i32 = arith.constant 0 : i32
    %c0_i32_0 = arith.constant 0 : i32
    %c0_i32_1 = arith.constant 0 : i32
    return %c0_i32, %c0_i32_0 : i32, i32
  }
  func.func @transform_4(%arg0: i32) -> (i32, i32) {
    %c0_i32 = arith.constant 0 : i32
    %c0_i32_0 = arith.constant 0 : i32
    %c0_i32_1 = arith.constant 0 : i32
    return %c0_i32, %c0_i32_0 : i32, i32
  }
  func.func @transform_5(%arg0: i32) -> (i32, i32) {
    %c0_i32 = arith.constant 0 : i32
    %c0_i32_0 = arith.constant 0 : i32
    %c0_i32_1 = arith.constant 0 : i32
    return %c0_i32, %c0_i32_0 : i32, i32
  }
  func.func @transform_6(%arg0: i32) -> (i32, i32) {
    %c0_i32 = arith.constant 0 : i32
    %c0_i32_0 = arith.constant 0 : i32
    %c0_i32_1 = arith.constant 0 : i32
    return %c0_i32, %c0_i32_0 : i32, i32
  }
  func.func @transform_7(%arg0: i32) -> (i32, i32) {
    %c0_i32 = arith.constant 0 : i32
    %c0_i32_0 = arith.constant 0 : i32
    %c0_i32_1 = arith.constant 0 : i32
    return %c0_i32, %c0_i32_0 : i32, i32
  }
  func.func @transform_8(%arg0: i32) -> (i32, i32) {
    %c0_i32 = arith.constant 0 : i32
    %c0_i32_0 = arith.constant 0 : i32
    %c0_i32_1 = arith.constant 0 : i32
    return %c0_i32, %c0_i32_0 : i32, i32
  }
  func.func @transform_9(%arg0: i32) -> (i32, i32) {
    %c0_i32 = arith.constant 0 : i32
    %c0_i32_0 = arith.constant 0 : i32
    return %arg0, %c0_i32 : i32, i32
  }
  func.func @transform_10(%arg0: i32) -> (i32, i32) {
    %c0_i32 = arith.constant 0 : i32
    %c0_i32_0 = arith.constant 0 : i32
    return %arg0, %c0_i32 : i32, i32
  }
}

</mosaic_0001>

<bundles_post_ra>
// kernel: ranker_gear_forward.2
= control target key start
LH: loop header
LB: loop body
LE: loop exit
PB: predicated region body
PF: predicated region fallthrough
CT: control target
= control target key end

     0   :  { %v45_v0 = vlaneseq  ;;  %vm663_vm5 = vcmask 130048   ;;  %v1176_v62 = vmov 0.0   ;;  %vm760_vm14 = vcmask 1041409   ;;  %s1550_s0 = inlined_call_operand.vmem [shape: s32[24,16], index: 0, kind: input, shape index: {}]   ;;  %s1551_s1 = inlined_call_operand.vmem [shape: f32[24,16], index: 1, kind: input, shape index: {}]   ;;  %s1552_s3 = inlined_call_operand.vmem [shape: bf16[128,128], index: 3, kind: input, shape index: {}]   ;;  %s1553_s2 = inlined_call_operand.vmem [shape: s32[24,16], index: 2, kind: input, shape index: {}]   ;;  %s1554_s5 = inlined_call_operand.vmem [shape: bf16[128,128], index: 5, kind: input, shape index: {}]   ;;  %s1555_s4 = inlined_call_operand.vmem [shape: f32[2,128], index: 4, kind: input, shape index: {}]   ;;  %s1556_s6 = inlined_call_operand.vmem [shape: f32[1,128], index: 6, kind: input, shape index: {}]   ;;  %s1557_s7 = inlined_call_operand.vmem [shape: f32[24,128], index: 7, kind: output, shape index: {}]  }
   0x1   :  { %v27_v1 = vld [vmem:[%s1550_s0] sm:$0xff]  ;;  %v1234_v5 = vld [vmem:[%s1551_s1 + $0x8] sm:$0xff]  ;;  %v1245_v8 = vld [vmem:[%s1551_s1 + $0x10] sm:$0xff] }
   0x2   :  { %v1223_v2 = vld [vmem:[%s1551_s1] sm:$0xff]  ;;  %v1227_v3 = vshrl.u32 %v45_v0, 7  ;;  %v28_v11 = vld [vmem:[%s1550_s0 + $0x8] sm:$0xff]  ;;  %vm40_vm1 = vcmp.gt.f32.partialorder %v1234_v5, 0.0  ;;  %v29_v12 = vld [vmem:[%s1550_s0 + $0x10] sm:$0xff]  ;;  %vm41_vm2 = vcmp.gt.f32.partialorder %v1245_v8, 0.0 }
   0x3   :  { %vm39_vm0 = vcmp.gt.f32.partialorder %v1223_v2, 0.0  ;;  %v43_v14 = vsel %vm40_vm1, %v28_v11, 128  ;;  %v1260_v15 = vsel %vm41_vm2, %v29_v12, 128  ;;  %v1148_v42 = vld [vmem:[%s1552_s3] sm:$0xff]   ;;  %v1149_v44 = vld [vmem:[%s1552_s3 + $0x8] sm:$0xff]   ;;  %v1150_v45 = vld [vmem:[%s1552_s3 + $0x10] sm:$0xff]  }
   0x4   :  { %v1229_v4 = vsel %vm39_vm0, %v27_v1, 128  ;;  %v1237_v6 = vsub.s32 1, %v1227_v3  ;;  %v1240_v7 = vsub.s32 0, %v1227_v3  ;;  %v115_v13 = vsub.s32 6, %v1227_v3  ;;  %1107 = vmatprep.subr.bf16.mxu0 %v1148_v42  ;;  %v1151_v46 = vld [vmem:[%s1552_s3 + $0x18] sm:$0xff]   ;;  %v1152_v47 = vld [vmem:[%s1552_s3 + $0x20] sm:$0xff]  }
   0x5   :  { %v126_v18 = vsub.s32 7, %v1227_v3  ;;  %v71_v25 = vsub.s32 2, %v1227_v3  ;;  %v82_v30 = vsub.s32 3, %v1227_v3  ;;  %v93_v34 = vsub.s32 4, %v1227_v3  ;;  %1108 = vmatpush3.bf16.msra.mxu0 %v1148_v42  ;;  %v1153_v48 = vld [vmem:[%s1552_s3 + $0x28] sm:$0xff]   ;;  %v1154_v49 = vld [vmem:[%s1552_s3 + $0x30] sm:$0xff]  }
   0x6   :  { %v61_v9 = vrot.slane %v1229_v4, %v1237_v6  ;;  %v50_v10 = vrot.slane %v1229_v4, %v1240_v7  ;;  %v116_v16 = vrot.slane %v1229_v4, %v115_v13  ;;  %v204_v17 = vrot.slane %v43_v14, %v115_v13  ;;  %1109 = vmatprep.subr.bf16.mxu0 %v1149_v44  ;;  %v1155_v50 = vld [vmem:[%s1552_s3 + $0x38] sm:$0xff]   ;;  %v33_v54 = vld [vmem:[%s1553_s2] sm:$0xff]  ;;  %v34_v55 = vld [vmem:[%s1553_s2 + $0x8] sm:$0xff] }
   0x7   :  { %v1265_v19 = vrot.slane %v1260_v15, %v115_v13  ;;  %v138_v20 = vrot.slane %v43_v14, %v1240_v7  ;;  %v1269_v21 = vrot.slane %v1229_v4, %v126_v18  ;;  %v1271_v22 = vrot.slane %v43_v14, %v126_v18  ;;  %v35_v60 = vld [vmem:[%s1553_s2 + $0x10] sm:$0xff] }
   0x8   :  { %63 = vbcast.lane.b32.xlu1 %v61_v9, 256  ;;  %52 = vbcast.lane.b32.xlu0 %v50_v10, 256  ;;  %v1274_v23 = vrot.slane %v1260_v15, %v126_v18  ;;  %v149_v24 = vrot.slane %v43_v14, %v1237_v6  ;;  %v72_v26 = vrot.slane %v1229_v4, %v71_v25  ;;  %v104_v38 = vsub.s32 5, %v1227_v3 }
   0x9   :  { %v160_v27 = vrot.slane %v43_v14, %v71_v25  ;;  %v226_v28 = vrot.slane %v1260_v15, %v1240_v7  ;;  %v237_v29 = vrot.slane %v1260_v15, %v1237_v6  ;;  %v83_v31 = vrot.slane %v1229_v4, %v82_v30  ;;  %1110 = vmatpush3.bf16.msra.mxu0 %v1149_v44 }
   0xa   :  { %v171_v32 = vrot.slane %v43_v14, %v82_v30  ;;  %v248_v33 = vrot.slane %v1260_v15, %v71_v25  ;;  %v94_v35 = vrot.slane %v1229_v4, %v93_v34  ;;  %v182_v36 = vrot.slane %v43_v14, %v93_v34  ;;  %1111 = vmatprep.subr.bf16.mxu0 %v1150_v45 }
   0xb   :  { %v259_v37 = vrot.slane %v1260_v15, %v82_v30  ;;  %v105_v39 = vrot.slane %v1229_v4, %v104_v38  ;;  %v193_v40 = vrot.slane %v43_v14, %v104_v38  ;;  %v270_v41 = vrot.slane %v1260_v15, %v93_v34 }
   0xc   :  { %67 = vbcast.lane.b32.xlu1 %v61_v9, 264  ;;  %56 = vbcast.lane.b32.xlu0 %v50_v10, 264  ;;  %v281_v43 = vrot.slane %v1260_v15, %v104_v38  ;;  %v1326_v51 = vand.u32 127, %v45_v0  ;;  %v664_v58 = vsel %vm663_vm5, %v1223_v2, 0.0  ;;  %v36_v59 = vcvt.s32.f32 %v33_v54 }
   0xd   :  { %1112 = vmatpush3.bf16.msra.mxu0 %v1150_v45  ;;  %v37_v61 = vcvt.s32.f32 %v34_v55  ;;  %v670_v12 = vsel %vm663_vm5, %v1245_v8, 0.0  ;;  %v38_v13 = vcvt.s32.f32 %v35_v60 }
   0xe   :  { %1113 = vmatprep.subr.bf16.mxu0 %v1151_v46  ;;  %v673_v18 = vmul.f32 %v36_v59, %v1223_v2 }
  0x10   :  { %144 = vbcast.lane.b32.xlu1 %v138_v20, 264  ;;  %140 = vbcast.lane.b32.xlu0 %v138_v20, 256  ;;  %v676_v30 = vsel %vm663_vm5, %v673_v18, 0.0 }
  0x11   :  { %1114 = vmatpush3.bf16.msra.mxu0 %v1151_v46 }
  0x12   :  { %1115 = vmatprep.subr.bf16.mxu0 %v1152_v47 }
  0x14   :  { %155 = vbcast.lane.b32.xlu1 %v149_v24, 264  ;;  %151 = vbcast.lane.b32.xlu0 %v149_v24, 256 }
  0x15   :  { %1116 = vmatpush3.bf16.msra.mxu0 %v1152_v47 }
  0x16   :  { %1117 = vmatprep.subr.bf16.mxu0 %v1153_v48 }
  0x18   :  { %78 = vbcast.lane.b32.xlu1 %v72_v26, 264  ;;  %74 = vbcast.lane.b32.xlu0 %v72_v26, 256  ;;  %v675_v26 = vmul.f32 %v38_v13, %v1245_v8  ;;  %v1156_v13 = vld [vmem:[%s1554_s5] sm:$0xff]  }
  0x19   :  { %1118 = vmatpush3.bf16.msra.mxu0 %v1153_v48  ;;  %1127 = vmatprep.subr.bf16.mxu1 %v1156_v13 }
  0x1a   :  { %1119 = vmatprep.subr.bf16.mxu0 %v1154_v49  ;;  %v682_v42 = vsel %vm663_vm5, %v675_v26, 0.0  ;;  %1128 = vmatpush3.bf16.msra.mxu1 %v1156_v13 }
  0x1c   :  { %166 = vbcast.lane.b32.xlu1 %v160_v27, 264  ;;  %162 = vbcast.lane.b32.xlu0 %v160_v27, 256 }
  0x1d   :  { %1120 = vmatpush3.bf16.msra.mxu0 %v1154_v49 }
  0x1e   :  { %1121 = vmatprep.subr.bf16.mxu0 %v1155_v50 }
  0x20   :  { %232 = vbcast.lane.b32.xlu1 %v226_v28, 264  ;;  %228 = vbcast.lane.b32.xlu0 %v226_v28, 256 }
  0x21   :  { %1122 = vmatpush3.bf16.msra.mxu0 %v1155_v50 }
  0x24   :  { %243 = vbcast.lane.b32.xlu1 %v237_v29, 264  ;;  %239 = vbcast.lane.b32.xlu0 %v237_v29, 256 }
  0x28   :  { %89 = vbcast.lane.b32.xlu1 %v83_v31, 264  ;;  %85 = vbcast.lane.b32.xlu0 %v83_v31, 256 }
  0x2c   :  { %177 = vbcast.lane.b32.xlu1 %v171_v32, 264  ;;  %173 = vbcast.lane.b32.xlu0 %v171_v32, 256 }
  0x30   :  { %254 = vbcast.lane.b32.xlu1 %v248_v33, 264  ;;  %250 = vbcast.lane.b32.xlu0 %v248_v33, 256 }
  0x34   :  { %100 = vbcast.lane.b32.xlu1 %v94_v35, 264  ;;  %96 = vbcast.lane.b32.xlu0 %v94_v35, 256 }
  0x38   :  { %188 = vbcast.lane.b32.xlu1 %v182_v36, 264  ;;  %184 = vbcast.lane.b32.xlu0 %v182_v36, 256 }
  0x3c   :  { %265 = vbcast.lane.b32.xlu1 %v259_v37, 264  ;;  %261 = vbcast.lane.b32.xlu0 %v259_v37, 256 }
  0x40   :  { %111 = vbcast.lane.b32.xlu1 %v105_v39, 264  ;;  %107 = vbcast.lane.b32.xlu0 %v105_v39, 256 }
  0x44   :  { %199 = vbcast.lane.b32.xlu1 %v193_v40, 264  ;;  %195 = vbcast.lane.b32.xlu0 %v193_v40, 256 }
  0x48   :  { %276 = vbcast.lane.b32.xlu1 %v270_v41, 264  ;;  %272 = vbcast.lane.b32.xlu0 %v270_v41, 256 }
  0x4c   :  { %122 = vbcast.lane.b32.xlu1 %v116_v16, 264  ;;  %118 = vbcast.lane.b32.xlu0 %v116_v16, 256 }
  0x50   :  { %210 = vbcast.lane.b32.xlu1 %v204_v17, 264  ;;  %206 = vbcast.lane.b32.xlu0 %v204_v17, 256 }
  0x54   :  { %287 = vbcast.lane.b32.xlu1 %v281_v43, 264  ;;  %283 = vbcast.lane.b32.xlu0 %v281_v43, 256 }
  0x58   :  { %133 = vbcast.lane.b32.xlu1 %v1269_v21, 264  ;;  %129 = vbcast.lane.b32.xlu0 %v1269_v21, 256 }
  0x5c   :  { %221 = vbcast.lane.b32.xlu1 %v1271_v22, 264  ;;  %217 = vbcast.lane.b32.xlu0 %v1271_v22, 256 }
  0x60   :  { %298 = vbcast.lane.b32.xlu1 %v1265_v19, 264  ;;  %294 = vbcast.lane.b32.xlu0 %v1265_v19, 256  ;;  %v674_v19 = vmul.f32 %v37_v61, %v1234_v5 }
  0x62   :  { %v679_v31 = vsel %vm663_vm5, %v674_v19, 0.0 }
  0x64   :  { %309 = vbcast.lane.b32.xlu1 %v1274_v23, 264  ;;  %305 = vbcast.lane.b32.xlu0 %v1274_v23, 256  ;;  %v667_v23 = vsel %vm663_vm5, %v1234_v5, 0.0 }
  0x7a   :  { %v64_v52 = vpop.permute.xlu1 %63  ;;  %v53_v53 = vpop.permute.xlu0 %52 }
  0x7b   :  { %vm313_vm3 = vcmp.eq.s32.totalorder %v64_v52, %v1326_v51  ;;  %vm311_vm4 = vcmp.eq.s32.totalorder %v53_v53, %v1326_v51 }
  0x7c   :  { %v1024_v63 = vsel %vm313_vm3, 1.0, %v1176_v62  ;;  %v1022_v0 = vsel %vm311_vm4, 1.0, %v1176_v62  ;;  %vm762_vm3 = vcmask 1042434  }
  0x7e   :  { %v68_v56 = vpop.permute.xlu1 %67  ;;  %v57_v57 = vpop.permute.xlu0 %56 }
  0x7f   :  { %vm314_vm6 = vcmp.eq.s32.totalorder %v68_v56, %v1326_v51  ;;  %vm312_vm7 = vcmp.eq.s32.totalorder %v57_v57, %v1326_v51 }
  0x80   :  { %v1025_v1 = vsel %vm314_vm6, 1.0, %v1176_v62  ;;  %v1023_v3 = vsel %vm312_vm7, 1.0, %v1176_v62 }
  0x81   :  { %v462_v4 = vadd.f32 %v1025_v1, %v1024_v63  ;;  %v455_v9 = vadd.f32 %v1023_v3, %v1022_v0 }
  0x82   :  { %v145_v10 = vpop.permute.xlu1 %144  ;;  %v141_v11 = vpop.permute.xlu0 %140 }
  0x83   :  { %v463_v14 = vrot.slane %v462_v4, 4  ;;  %v456_v15 = vrot.slane %v455_v9, 4  ;;  %vm328_vm8 = vcmp.eq.s32.totalorder %v145_v10, %v1326_v51  ;;  %vm327_vm9 = vcmp.eq.s32.totalorder %v141_v11, %v1326_v51  ;;  %665 = vadd.xlane.f32.xlu0 %v664_v58 }
  0x84   :  { %v1039_v16 = vsel %vm328_vm8, 1.0, %v1176_v62  ;;  %v1038_v17 = vsel %vm327_vm9, 1.0, %v1176_v62 }
  0x85   :  { %v464_v20 = vadd.f32 %v463_v14, %v462_v4  ;;  %v457_v21 = vadd.f32 %v456_v15, %v455_v9  ;;  %v511_v22 = vadd.f32 %v1039_v16, %v1038_v17 }
  0x86   :  { %v156_v24 = vpop.permute.xlu1 %155  ;;  %v152_v25 = vpop.permute.xlu0 %151 }
  0x87   :  { %v465_v27 = vrot.slane %v464_v20, 2  ;;  %v458_v28 = vrot.slane %v457_v21, 2  ;;  %v512_v29 = vrot.slane %v511_v22, 4  ;;  %vm330_vm10 = vcmp.eq.s32.totalorder %v156_v24, %v1326_v51  ;;  %671 = vadd.xlane.f32.xlu0 %v670_v12 }
  0x88   :  { %v1041_v2 = vsel %vm330_vm10, 1.0, %v1176_v62  ;;  %vm329_vm11 = vcmp.eq.s32.totalorder %v152_v25, %v1326_v51  ;;  %668 = vadd.xlane.f32.xlu1 %v667_v23 }
  0x89   :  { %v466_v5 = vadd.f32 %v465_v27, %v464_v20  ;;  %v459_v32 = vadd.f32 %v458_v28, %v457_v21  ;;  %v513_v33 = vadd.f32 %v512_v29, %v511_v22  ;;  %v1040_v8 = vsel %vm329_vm11, 1.0, %v1176_v62  ;;  %v1157_v20 = vld [vmem:[%s1554_s5 + $0x8] sm:$0xff]  }
  0x8a   :  { %v518_v34 = vadd.f32 %v1041_v2, %v1040_v8  ;;  %v79_v35 = vpop.permute.xlu1 %78  ;;  %v75_v36 = vpop.permute.xlu0 %74  ;;  %1129 = vmatprep.subr.bf16.mxu1 %v1157_v20  ;;  %v1158_v2 = vld [vmem:[%s1554_s5 + $0x10] sm:$0xff]  }
  0x8b   :  { %v467_v37 = vrot.slane %v466_v5, 1  ;;  %v460_v38 = vrot.slane %v459_v32, 1  ;;  %v514_v39 = vrot.slane %v513_v33, 2  ;;  %vm316_vm12 = vcmp.eq.s32.totalorder %v79_v35, %v1326_v51  ;;  %677 = vadd.xlane.f32.xlu0 %v676_v30  ;;  %1130 = vmatpush3.bf16.msra.mxu1 %v1157_v20 }
  0x8c   :  { %v519_v40 = vrot.slane %v518_v34, 4  ;;  %v1027_v41 = vsel %vm316_vm12, 1.0, %v1176_v62  ;;  %vm315_vm13 = vcmp.eq.s32.totalorder %v75_v36, %v1326_v51  ;;  %680 = vadd.xlane.f32.xlu1 %v679_v31  ;;  %1131 = vmatprep.subr.bf16.mxu1 %v1158_v2 }
  0x8d   :  { %v468_v43 = vadd.f32 %v467_v37, %v466_v5  ;;  %v461_v44 = vadd.f32 %v460_v38, %v459_v32  ;;  %v515_v45 = vadd.f32 %v514_v39, %v513_v33  ;;  %v1026_v46 = vsel %vm315_vm13, 1.0, %v1176_v62  ;;  %v1159_v38 = vld [vmem:[%s1554_s5 + $0x18] sm:$0xff]  }
  0x8e   :  { %v520_v47 = vadd.f32 %v519_v40, %v518_v34  ;;  %v469_v48 = vadd.f32 %v1027_v41, %v1026_v46  ;;  %v167_v49 = vpop.permute.xlu1 %166  ;;  %v163_v50 = vpop.permute.xlu0 %162 }
  0x8f   :  { %v624_v52 = vpack.c.bf16 %v468_v43, %v468_v43  ;;  %v623_v53 = vpack.c.bf16 %v461_v44, %v461_v44  ;;  %v516_v54 = vrot.slane %v515_v45, 1  ;;  %vm332_vm15 = vcmp.eq.s32.totalorder %v167_v49, %v1326_v51  ;;  %683 = vadd.xlane.f32.xlu0 %v682_v42  ;;  %1132 = vmatpush3.bf16.msra.mxu1 %v1158_v2  ;;  %v1160_v44 = vld [vmem:[%s1554_s5 + $0x20] sm:$0xff]  }
  0x90   :  { %v521_v55 = vrot.slane %v520_v47, 2  ;;  %v470_v56 = vrot.slane %v469_v48, 4  ;;  %v1043_v57 = vsel %vm332_vm15, 1.0, %v1176_v62  ;;  %vm331_vm0 = vcmp.eq.s32.totalorder %v163_v50, %v1326_v51  ;;  %1133 = vmatprep.subr.bf16.mxu1 %v1159_v38 }
  0x91   :  { %v737_v58 = vunpack.c.l.b16 %v624_v52  ;;  %v736_v59 = vunpack.c.l.b16 %v623_v53  ;;  %v1042_v60 = vsel %vm331_vm0, 1.0, %v1176_v62  ;;  %v517_v61 = vadd.f32 %v516_v54, %v515_v45  ;;  %v1161_v54 = vld [vmem:[%s1554_s5 + $0x28] sm:$0xff]  }
  0x92   :  { %v522_v63 = vadd.f32 %v521_v55, %v520_v47  ;;  %v471_v0 = vadd.f32 %v470_v56, %v469_v48  ;;  %v525_v1 = vadd.f32 %v1043_v57, %v1042_v60  ;;  %v1373_v3 = vpop.permute.xlu1 %232  ;;  %v1375_v4 = vpop.permute.xlu0 %228  ;;  %vm764_vm15 = vcmask 1043459  }
  0x93   :  { %v761_v9 = vsel %vm760_vm14, %v737_v58, %v736_v59  ;;  %v631_v14 = vpack.c.bf16 %v517_v61, %v517_v61  ;;  %1134 = vmatpush3.bf16.msra.mxu1 %v1159_v38  ;;  %vm344_vm8 = vcmp.eq.s32.totalorder %v1373_v3, %v1326_v51  ;;  %vm343_vm9 = vcmp.eq.s32.totalorder %v1375_v4, %v1326_v51 }
  0x94   :  { %v523_v10 = vrot.slane %v522_v63, 1  ;;  %v472_v11 = vrot.slane %v471_v0, 2  ;;  %v526_v12 = vrot.slane %v525_v1, 4  ;;  %1135 = vmatprep.subr.bf16.mxu1 %v1160_v44  ;;  %v1054_v4 = vsel %vm343_vm9, 1.0, %v1176_v62 }
  0x95   :  { %v744_v24 = vunpack.c.l.b16 %v631_v14 }
  0x96   :  { %v524_v15 = vadd.f32 %v523_v10, %v522_v63  ;;  %v473_v16 = vadd.f32 %v472_v11, %v471_v0  ;;  %v527_v17 = vadd.f32 %v526_v12, %v525_v1  ;;  %v1381_v18 = vpop.permute.xlu1 %243  ;;  %v1383_v19 = vpop.permute.xlu0 %239  ;;  %v1055_v11 = vsel %vm344_vm8, 1.0, %v1176_v62 }
  0x97   :  { %1136 = vmatpush3.bf16.msra.mxu1 %v1160_v44  ;;  %vm346_vm10 = vcmp.eq.s32.totalorder %v1381_v18, %v1326_v51  ;;  %vm345_vm11 = vcmp.eq.s32.totalorder %v1383_v19, %v1326_v51 }
  0x98   :  { %v632_v21 = vpack.c.bf16 %v524_v15, %v524_v15  ;;  %v474_v22 = vrot.slane %v473_v16, 1  ;;  %v528_v23 = vrot.slane %v527_v17, 2  ;;  %1137 = vmatprep.subr.bf16.mxu1 %v1161_v54  ;;  %v1057_v15 = vsel %vm346_vm10, 1.0, %v1176_v62 }
  0x9a   :  { %v745_v25 = vunpack.c.l.b16 %v632_v21  ;;  %v475_v26 = vadd.f32 %v474_v22, %v473_v16  ;;  %v529_v27 = vadd.f32 %v528_v23, %v527_v17  ;;  %v90_v28 = vpop.permute.xlu1 %89  ;;  %v86_v29 = vpop.permute.xlu0 %85  ;;  %v1056_v16 = vsel %vm345_vm11, 1.0, %v1176_v62 }
  0x9b   :  { %vm318_vm1 = vcmp.eq.s32.totalorder %v90_v28, %v1326_v51  ;;  %vm317_vm2 = vcmp.eq.s32.totalorder %v86_v29, %v1326_v51  ;;  %1138 = vmatpush3.bf16.msra.mxu1 %v1161_v54  ;;  %vm768_vm11 = vcmask 1045509  }
  0x9c   :  { %v774_v30 = vsel %vm760_vm14, %v745_v25, %v744_v24  ;;  %v625_v31 = vpack.c.bf16 %v475_v26, %v475_v26  ;;  %v530_v5 = vrot.slane %v529_v27, 1  ;;  %v1029_v32 = vsel %vm318_vm1, 1.0, %v1176_v62 }
  0x9d   :  { %v1028_v33 = vsel %vm317_vm2, 1.0, %v1176_v62  ;;  %v567_v25 = vadd.f32 %v1055_v11, %v1054_v4 }
  0x9e   :  { %v738_v8 = vunpack.c.l.b16 %v625_v31  ;;  %v531_v34 = vadd.f32 %v530_v5, %v529_v27  ;;  %v476_v35 = vadd.f32 %v1029_v32, %v1028_v33  ;;  %v178_v36 = vpop.permute.xlu1 %177  ;;  %v174_v37 = vpop.permute.xlu0 %173  ;;  %v574_v27 = vadd.f32 %v1057_v15, %v1056_v16 }
  0x9f   :  { %vm334_vm4 = vcmp.eq.s32.totalorder %v178_v36, %v1326_v51  ;;  %vm333_vm5 = vcmp.eq.s32.totalorder %v174_v37, %v1326_v51  ;;  %v568_v33 = vrot.slane %v567_v25, 4 }
  0xa0   :  { %v633_v39 = vpack.c.bf16 %v531_v34, %v531_v34  ;;  %v477_v40 = vrot.slane %v476_v35, 4  ;;  %v1045_v41 = vsel %vm334_vm4, 1.0, %v1176_v62  ;;  %v1044_v42 = vsel %vm333_vm5, 1.0, %v1176_v62 }
  0xa1   :  { %v763_v43 = vsel %vm762_vm3, %v738_v8, %v761_v9  ;;  %v532_v47 = vadd.f32 %v1045_v41, %v1044_v42  ;;  %v575_v34 = vrot.slane %v574_v27, 4  ;;  %v569_v44 = vadd.f32 %v568_v33, %v567_v25 }
  0xa2   :  { %v746_v45 = vunpack.c.l.b16 %v633_v39  ;;  %v478_v46 = vadd.f32 %v477_v40, %v476_v35  ;;  %v1407_v48 = vpop.permute.xlu1 %254  ;;  %v1409_v49 = vpop.permute.xlu0 %250  ;;  %vm766_vm5 = vcmask 1044484  }
  0xa3   :  { %v533_v52 = vrot.slane %v532_v47, 4 }
  0xa4   :  { %v479_v50 = vrot.slane %v478_v46, 2  ;;  %v1412_v53 = vsel %vm762_vm3, %v746_v45, %v774_v30 }
  0xa5   :  { %v534_v56 = vadd.f32 %v533_v52, %v532_v47 }
  0xa6   :  { %v480_v55 = vadd.f32 %v479_v50, %v478_v46  ;;  %v101_v57 = vpop.permute.xlu1 %100  ;;  %v97_v58 = vpop.permute.xlu0 %96  ;;  %v576_v46 = vadd.f32 %v575_v34, %v574_v27 }
  0xa7   :  { %vm320_vm6 = vcmp.eq.s32.totalorder %v101_v57, %v1326_v51  ;;  %vm319_vm7 = vcmp.eq.s32.totalorder %v97_v58, %v1326_v51  ;;  %v535_v60 = vrot.slane %v534_v56, 2 }
  0xa8   :  { %v481_v59 = vrot.slane %v480_v55, 1  ;;  %v1031_v61 = vsel %vm320_vm6, 1.0, %v1176_v62  ;;  %v1030_v63 = vsel %vm319_vm7, 1.0, %v1176_v62  ;;  %vm348_vm6 = vcmp.eq.s32.totalorder %v1407_v48, %v1326_v51 }
  0xa9   :  { %v536_v1 = vadd.f32 %v535_v60, %v534_v56  ;;  %v483_v3 = vadd.f32 %v1031_v61, %v1030_v63  ;;  %v570_v60 = vrot.slane %v569_v44, 2  ;;  %v577_v63 = vrot.slane %v576_v46, 2 }
  0xaa   :  { %v482_v0 = vadd.f32 %v481_v59, %v480_v55  ;;  %v189_v9 = vpop.permute.xlu1 %188  ;;  %v185_v10 = vpop.permute.xlu0 %184  ;;  %vm347_vm7 = vcmp.eq.s32.totalorder %v1409_v49, %v1326_v51 }
  0xab   :  { %vm336_vm12 = vcmp.eq.s32.totalorder %v189_v9, %v1326_v51  ;;  %vm335_vm13 = vcmp.eq.s32.totalorder %v185_v10, %v1326_v51  ;;  %v537_v13 = vrot.slane %v536_v1, 1  ;;  %v484_v14 = vrot.slane %v483_v3, 4 }
  0xac   :  { %v626_v12 = vpack.c.bf16 %v482_v0, %v482_v0  ;;  %v1047_v17 = vsel %vm336_vm12, 1.0, %v1176_v62  ;;  %v1046_v19 = vsel %vm335_vm13, 1.0, %v1176_v62  ;;  %v578_v34 = vadd.f32 %v577_v63, %v576_v46 }
  0xad   :  { %v538_v21 = vadd.f32 %v537_v13, %v536_v1  ;;  %v485_v22 = vadd.f32 %v484_v14, %v483_v3  ;;  %v539_v26 = vadd.f32 %v1047_v17, %v1046_v19  ;;  %v1059_v3 = vsel %vm348_vm6, 1.0, %v1176_v62 }
  0xae   :  { %v739_v20 = vunpack.c.l.b16 %v626_v12  ;;  %v1440_v23 = vpop.permute.xlu1 %265  ;;  %v1442_v24 = vpop.permute.xlu0 %261  ;;  %v1058_v14 = vsel %vm347_vm7, 1.0, %v1176_v62  ;;  %vm770_vm7 = vcmask 1046534  }
  0xaf   :  { %v634_v28 = vpack.c.bf16 %v538_v21, %v538_v21  ;;  %v486_v18 = vrot.slane %v485_v22, 2  ;;  %v540_v29 = vrot.slane %v539_v26, 4  ;;  %vm350_vm8 = vcmp.eq.s32.totalorder %v1440_v23, %v1326_v51 }
  0xb0   :  { %v765_v2 = vsel %vm764_vm15, %v739_v20, %v763_v43  ;;  %vm349_vm9 = vcmp.eq.s32.totalorder %v1442_v24, %v1326_v51  ;;  %v1061_v15 = vsel %vm350_vm8, 1.0, %v1176_v62 }
  0xb1   :  { %v747_v30 = vunpack.c.l.b16 %v634_v28  ;;  %v487_v31 = vadd.f32 %v486_v18, %v485_v22  ;;  %v541_v8 = vadd.f32 %v540_v29, %v539_v26  ;;  %v1060_v19 = vsel %vm349_vm9, 1.0, %v1176_v62 }
  0xb2   :  { %v112_v5 = vpop.permute.xlu1 %111  ;;  %v108_v32 = vpop.permute.xlu0 %107  ;;  %v581_v28 = vadd.f32 %v1059_v3, %v1058_v14  ;;  %v588_v29 = vadd.f32 %v1061_v15, %v1060_v19 }
  0xb3   :  { %vm322_vm0 = vcmp.eq.s32.totalorder %v112_v5, %v1326_v51  ;;  %vm321_vm1 = vcmp.eq.s32.totalorder %v108_v32, %v1326_v51  ;;  %v488_v35 = vrot.slane %v487_v31, 1  ;;  %v542_v37 = vrot.slane %v541_v8, 2 }
  0xb4   :  { %v1033_v36 = vsel %vm322_vm0, 1.0, %v1176_v62  ;;  %v1032_v38 = vsel %vm321_vm1, 1.0, %v1176_v62  ;;  %v776_v39 = vsel %vm764_vm15, %v747_v30, %v1412_v53  ;;  %v1485_v5 = vadd.f32 %v570_v60, %v569_v44 }
  0xb5   :  { %v489_v40 = vadd.f32 %v488_v35, %v487_v31  ;;  %v490_v41 = vadd.f32 %v1033_v36, %v1032_v38  ;;  %v543_v45 = vadd.f32 %v542_v37, %v541_v8 }
  0xb6   :  { %v200_v42 = vpop.permute.xlu1 %199  ;;  %v196_v43 = vpop.permute.xlu0 %195 }
  0xb7   :  { %vm338_vm2 = vcmp.eq.s32.totalorder %v200_v42, %v1326_v51  ;;  %vm337_vm4 = vcmp.eq.s32.totalorder %v196_v43, %v1326_v51  ;;  %v627_v47 = vpack.c.bf16 %v489_v40, %v489_v40  ;;  %v491_v50 = vrot.slane %v490_v41, 4 }
  0xb8   :  { %v544_v52 = vrot.slane %v543_v45, 1  ;;  %v1049_v54 = vsel %vm338_vm2, 1.0, %v1176_v62  ;;  %v1048_v55 = vsel %vm337_vm4, 1.0, %v1176_v62  ;;  %v582_v40 = vrot.slane %v581_v28, 4 }
  0xb9   :  { %v740_v53 = vunpack.c.l.b16 %v627_v47  ;;  %v492_v56 = vadd.f32 %v491_v50, %v490_v41  ;;  %v546_v57 = vadd.f32 %v1049_v54, %v1048_v55  ;;  %v589_v42 = vrot.slane %v588_v29, 4 }
  0xba   :  { %v277_v58 = vpop.permute.xlu1 %276  ;;  %v273_v59 = vpop.permute.xlu0 %272  ;;  %v545_v61 = vadd.f32 %v544_v52, %v543_v45  ;;  %v579_v54 = vrot.slane %v578_v34, 1 }
  0xbb   :  { %v493_v0 = vrot.slane %v492_v56, 2  ;;  %v547_v1 = vrot.slane %v546_v57, 4  ;;  %v767_v48 = vsel %vm766_vm5, %v740_v53, %v765_v2  ;;  %vm352_vm10 = vcmp.eq.s32.totalorder %v277_v58, %v1326_v51 }
  0xbc   :  { %v635_v9 = vpack.c.bf16 %v545_v61, %v545_v61  ;;  %vm351_vm12 = vcmp.eq.s32.totalorder %v273_v59, %v1326_v51  ;;  %v1063_v25 = vsel %vm352_vm10, 1.0, %v1176_v62  ;;  %v583_v59 = vadd.f32 %v582_v40, %v581_v28 }
  0xbd   :  { %v494_v10 = vadd.f32 %v493_v0, %v492_v56  ;;  %v548_v11 = vadd.f32 %v547_v1, %v546_v57  ;;  %v1062_v49 = vsel %vm351_vm12, 1.0, %v1176_v62  ;;  %v590_v61 = vadd.f32 %v589_v42, %v588_v29 }
  0xbe   :  { %v123_v4 = vpop.permute.xlu1 %122  ;;  %v119_v12 = vpop.permute.xlu0 %118  ;;  %v748_v13 = vunpack.c.l.b16 %v635_v9  ;;  %v595_v32 = vadd.f32 %v1063_v25, %v1062_v49 }
  0xbf   :  { %vm324_vm13 = vcmp.eq.s32.totalorder %v123_v4, %v1326_v51  ;;  %vm323_vm0 = vcmp.eq.s32.totalorder %v119_v12, %v1326_v51  ;;  %v495_v16 = vrot.slane %v494_v10, 1  ;;  %v549_v17 = vrot.slane %v548_v11, 2 }
  0xc0   :  { %v1035_v20 = vsel %vm324_vm13, 1.0, %v1176_v62  ;;  %v1034_v21 = vsel %vm323_vm0, 1.0, %v1176_v62  ;;  %v777_v22 = vsel %vm766_vm5, %v748_v13, %v776_v39  ;;  %v596_v47 = vrot.slane %v595_v32, 4 }
  0xc1   :  { %v496_v23 = vadd.f32 %v495_v16, %v494_v10  ;;  %v550_v24 = vadd.f32 %v549_v17, %v548_v11  ;;  %v497_v18 = vadd.f32 %v1035_v20, %v1034_v21  ;;  %v572_v11 = vrot.slane %v1485_v5, 1 }
  0xc2   :  { %v211_v26 = vpop.permute.xlu1 %210  ;;  %v207_v27 = vpop.permute.xlu0 %206  ;;  %v597_v3 = vadd.f32 %v596_v47, %v595_v32  ;;  %v584_v16 = vrot.slane %v583_v59, 2  ;;  %v591_v19 = vrot.slane %v590_v61, 2 }
  0xc3   :  { %vm340_vm1 = vcmp.eq.s32.totalorder %v211_v26, %v1326_v51  ;;  %vm339_vm2 = vcmp.eq.s32.totalorder %v207_v27, %v1326_v51  ;;  %v628_v2 = vpack.c.bf16 %v496_v23, %v496_v23  ;;  %v551_v30 = vrot.slane %v550_v24, 1 }
  0xc4   :  { %v1051_v31 = vsel %vm340_vm1, 1.0, %v1176_v62  ;;  %v498_v33 = vrot.slane %v497_v18, 4  ;;  %v1050_v8 = vsel %vm339_vm2, 1.0, %v1176_v62  ;;  %v592_v32 = vadd.f32 %v591_v19, %v590_v61 }
  0xc5   :  { %v741_v35 = vunpack.c.l.b16 %v628_v2  ;;  %v552_v36 = vadd.f32 %v551_v30, %v550_v24  ;;  %v553_v37 = vadd.f32 %v1051_v31, %v1050_v8  ;;  %v1502_v24 = vadd.f32 %v579_v54, %v578_v34 }
  0xc6   :  { %v288_v38 = vpop.permute.xlu1 %287  ;;  %v284_v39 = vpop.permute.xlu0 %283  ;;  %v499_v41 = vadd.f32 %v498_v33, %v497_v18  ;;  %v585_v30 = vadd.f32 %v584_v16, %v583_v59 }
  0xc7   :  { %vm354_vm4 = vcmp.eq.s32.totalorder %v288_v38, %v1326_v51  ;;  %vm353_vm6 = vcmp.eq.s32.totalorder %v284_v39, %v1326_v51  ;;  %v636_v43 = vpack.c.bf16 %v552_v36, %v552_v36  ;;  %v554_v44 = vrot.slane %v553_v37, 4 }
  0xc8   :  { %v1065_v45 = vsel %vm354_vm4, 1.0, %v1176_v62  ;;  %v500_v50 = vrot.slane %v499_v41, 2  ;;  %v1064_v46 = vsel %vm353_vm6, 1.0, %v1176_v62  ;;  %v769_v52 = vsel %vm768_vm11, %v741_v35, %v767_v48 }
  0xc9   :  { %v749_v55 = vunpack.c.l.b16 %v636_v43  ;;  %v555_v53 = vadd.f32 %v554_v44, %v553_v37  ;;  %v602_v56 = vadd.f32 %v1065_v45, %v1064_v46  ;;  %v586_v45 = vrot.slane %v585_v30, 1 }
  0xca   :  { %v134_v57 = vpop.permute.xlu1 %133  ;;  %v130_v58 = vpop.permute.xlu0 %129  ;;  %v501_v60 = vadd.f32 %v500_v50, %v499_v41  ;;  %v593_v50 = vrot.slane %v592_v32, 1  ;;  %vm772_vm4 = vcmask 1047559  }
  0xcb   :  { %vm326_vm8 = vcmp.eq.s32.totalorder %v134_v57, %v1326_v51  ;;  %vm325_vm9 = vcmp.eq.s32.totalorder %v130_v58, %v1326_v51  ;;  %v556_v63 = vrot.slane %v555_v53, 2  ;;  %v603_v0 = vrot.slane %v602_v56, 4 }
  0xcc   :  { %v1037_v1 = vsel %vm326_vm8, 1.0, %v1176_v62  ;;  %v502_v9 = vrot.slane %v501_v60, 1  ;;  %v1036_v48 = vsel %vm325_vm9, 1.0, %v1176_v62  ;;  %v778_v10 = vsel %vm768_vm11, %v749_v55, %v777_v22 }
  0xcd   :  { %v557_v4 = vadd.f32 %v556_v63, %v555_v53  ;;  %v604_v12 = vadd.f32 %v603_v0, %v602_v56  ;;  %v504_v13 = vadd.f32 %v1037_v1, %v1036_v48  ;;  %v598_v22 = vrot.slane %v597_v3, 2 }
  0xce   :  { %v222_v14 = vpop.permute.xlu1 %221  ;;  %v218_v15 = vpop.permute.xlu0 %217  ;;  %v503_v17 = vadd.f32 %v502_v9, %v501_v60  ;;  %v573_v63 = vadd.f32 %v572_v11, %v1485_v5  ;;  %v587_v0 = vadd.f32 %v586_v45, %v585_v30  ;;  %v594_v1 = vadd.f32 %v593_v50, %v592_v32  ;;  %v1163_v50 = vld [vmem:[%s1554_s5 + $0x38] sm:$0xff]  }
  0xcf   :  { %vm342_vm10 = vcmp.eq.s32.totalorder %v222_v14, %v1326_v51  ;;  %vm341_vm12 = vcmp.eq.s32.totalorder %v218_v15, %v1326_v51  ;;  %v558_v20 = vrot.slane %v557_v4, 1  ;;  %v505_v21 = vrot.slane %v504_v13, 4 }
  0xd0   :  { %v1053_v23 = vsel %vm342_vm10, 1.0, %v1176_v62  ;;  %v1052_v25 = vsel %vm341_vm12, 1.0, %v1176_v62  ;;  %v629_v49 = vpack.c.bf16 %v503_v17, %v503_v17  ;;  %v605_v27 = vrot.slane %v604_v12, 2 }
  0xd1   :  { %v559_v26 = vadd.f32 %v558_v20, %v557_v4  ;;  %v506_v28 = vadd.f32 %v505_v21, %v504_v13  ;;  %v560_v18 = vadd.f32 %v1053_v23, %v1052_v25  ;;  %v599_v35 = vadd.f32 %v598_v22, %v597_v3 }
  0xd2   :  { %v299_v29 = vpop.permute.xlu1 %298  ;;  %v295_v2 = vpop.permute.xlu0 %294  ;;  %v742_v31 = vunpack.c.l.b16 %v629_v49  ;;  %v606_v39 = vadd.f32 %v605_v27, %v604_v12  ;;  %v640_v4 = vpack.c.bf16 %v1502_v24, %v1502_v24  ;;  %v639_v16 = vpack.c.bf16 %v573_v63, %v573_v63 }
  0xd3   :  { %vm356_vm13 = vcmp.eq.s32.totalorder %v299_v29, %v1326_v51  ;;  %vm355_vm0 = vcmp.eq.s32.totalorder %v295_v2, %v1326_v51  ;;  %v507_v33 = vrot.slane %v506_v28, 2  ;;  %v561_v8 = vrot.slane %v560_v18, 4 }
  0xd4   :  { %v1067_v34 = vsel %vm356_vm13, 1.0, %v1176_v62  ;;  %v1066_v36 = vsel %vm355_vm0, 1.0, %v1176_v62  ;;  %v637_v37 = vpack.c.bf16 %v559_v26, %v559_v26  ;;  %v771_v38 = vsel %vm770_vm7, %v742_v31, %v769_v52 }
  0xd5   :  { %v508_v40 = vadd.f32 %v507_v33, %v506_v28  ;;  %v562_v41 = vadd.f32 %v561_v8, %v560_v18  ;;  %v609_v42 = vadd.f32 %v1067_v34, %v1066_v36  ;;  %v600_v53 = vrot.slane %v599_v35, 1 }
  0xd6   :  { %v310_v43 = vpop.permute.xlu1 %309  ;;  %v306_v44 = vpop.permute.xlu0 %305  ;;  %v750_v47 = vunpack.c.l.b16 %v637_v37  ;;  %v607_v58 = vrot.slane %v606_v39, 1  ;;  %v641_v17 = vpack.c.bf16 %v587_v0, %v587_v0  ;;  %v642_v5 = vpack.c.bf16 %v594_v1, %v594_v1 }
  0xd7   :  { %vm358_vm1 = vcmp.eq.s32.totalorder %v310_v43, %v1326_v51  ;;  %vm357_vm2 = vcmp.eq.s32.totalorder %v306_v44, %v1326_v51  ;;  %v563_v46 = vrot.slane %v562_v41, 2  ;;  %v610_v54 = vrot.slane %v609_v42, 4 }
  0xd8   :  { %v1069_v55 = vsel %vm358_vm1, 1.0, %v1176_v62  ;;  %v1068_v52 = vsel %vm357_vm2, 1.0, %v1176_v62  ;;  %v509_v56 = vrot.slane %v508_v40, 1  ;;  %v779_v57 = vsel %vm770_vm7, %v750_v47, %v778_v10  ;;  %v1162_v47 = vld [vmem:[%s1554_s5 + $0x30] sm:$0xff]  }
  0xd9   :  { %v564_v59 = vadd.f32 %v563_v46, %v562_v41  ;;  %v611_v60 = vadd.f32 %v610_v54, %v609_v42  ;;  %v616_v61 = vadd.f32 %v1069_v55, %v1068_v52  ;;  %v601_v12 = vadd.f32 %v600_v53, %v599_v35  ;;  %1139 = vmatprep.subr.bf16.mxu1 %v1162_v47 }
  0xda   :  { %v510_v51 = vadd.f32 %v509_v56, %v508_v40  ;;  %v608_v13 = vadd.f32 %v607_v58, %v606_v39  ;;  %v753_v23 = vunpack.c.l.b16 %v640_v4  ;;  %v752_v28 = vunpack.c.l.b16 %v639_v16  ;;  %1140 = vmatpush3.bf16.msra.mxu1 %v1162_v47 }
  0xdb   :  { %v612_v3 = vrot.slane %v611_v60, 2  ;;  %v617_v9 = vrot.slane %v616_v61, 4  ;;  %v565_v48 = vrot.slane %v564_v59, 1  ;;  %v643_v22 = vpack.c.bf16 %v601_v12, %v601_v12  ;;  %1141 = vmatprep.subr.bf16.mxu1 %v1163_v50 }
  0xdc   :  { %v630_v62 = vpack.c.bf16 %v510_v51, %v510_v51  ;;  %v644_v49 = vpack.c.bf16 %v608_v13, %v608_v13  ;;  %v754_v18 = vunpack.c.l.b16 %v641_v17  ;;  %v755_v29 = vunpack.c.l.b16 %v642_v5 }
  0xdd   :  { %v613_v10 = vadd.f32 %v612_v3, %v611_v60  ;;  %v618_v14 = vadd.f32 %v617_v9, %v616_v61  ;;  %v566_v15 = vadd.f32 %v565_v48, %v564_v59  ;;  %v756_v32 = vunpack.c.l.b16 %v643_v22 }
  0xde   :  { %v743_v19 = vunpack.c.l.b16 %v630_v62  ;;  %v781_v8 = vsel %vm760_vm14, %v753_v23, %v752_v28  ;;  %v757_v34 = vunpack.c.l.b16 %v644_v49  ;;  %1142 = vmatpush3.bf16.msra.mxu1 %v1163_v50 }
  0xdf   :  { %v614_v11 = vrot.slane %v613_v10, 1  ;;  %v619_v20 = vrot.slane %v618_v14, 2  ;;  %v638_v21 = vpack.c.bf16 %v566_v15, %v566_v15  ;;  %v782_v36 = vsel %vm762_vm3, %v754_v18, %v781_v8 }
  0xe0   :  { %v773_v25 = vsel %vm772_vm4, %v743_v19, %v771_v38  ;;  %v783_v39 = vsel %vm764_vm15, %v755_v29, %v782_v36 }
  0xe1   :  { %v615_v24 = vadd.f32 %v614_v11, %v613_v10  ;;  %v620_v26 = vadd.f32 %v619_v20, %v618_v14  ;;  %v751_v27 = vunpack.c.l.b16 %v638_v21  ;;  %v784_v40 = vsel %vm766_vm5, %v756_v32, %v783_v39 }
  0xe2   :  { %v785_v42 = vsel %vm768_vm11, %v757_v34, %v784_v40 }
  0xe3   :  { %v645_v2 = vpack.c.bf16 %v615_v24, %v615_v24  ;;  %v621_v30 = vrot.slane %v620_v26, 1  ;;  %v780_v31 = vsel %vm772_vm4, %v751_v27, %v779_v57  ;;  %v688_v57 = vld [vmem:[%s1555_s4] sm:$0x3] }
  0xe4   :  { %v788_v33 = vpack.c.b16 %v780_v31, %v773_v25  ;;  %v692_v63 = vrot.slane %v688_v57, %v1240_v7  ;;  %v699_v0 = vrot.slane %v688_v57, %v1237_v6 }
  0xe5   :  { %v622_v35 = vadd.f32 %v621_v30, %v620_v26  ;;  %v758_v37 = vunpack.c.l.b16 %v645_v2  ;;  %v1078_v26 = vld [vmem:[%s1556_s6] ss:$0 sm:$0xff] }
  0xe6   :  { %1123 = vmatprep.mubr.bf16.mxu0 %v788_v33 }
  0xe7   :  { %v646_v38 = vpack.c.bf16 %v622_v35, %v622_v35  ;;  %v786_v43 = vsel %vm770_vm7, %v758_v37, %v785_v42 }
  0xe9   :  { %v759_v41 = vunpack.c.l.b16 %v646_v38 }
  0xeb   :  { %v787_v44 = vsel %vm772_vm4, %v759_v41, %v786_v43 }
  0xec   :  { %v789_v45 = vpack.c.b16 %v787_v44, %v787_v44 }
  0xee   :  { %1124 = vmatmul.mubr.bf16.vlgmr.msra.gmra.mrb[0].mxu0 %v789_v45 }
 0x110   :  { %v666_v46 = vpop.xlane.xlu0 %665 }
 0x111   :  { %v706_v59 = vmax.f32 %v666_v46, 1.0 }
 0x114   :  { %v672_v54 = vpop.xlane.xlu0 %671 }
 0x115   :  { %v669_v53 = vpop.xlane.xlu1 %668  ;;  %v708_v52 = vmax.f32 %v672_v54, 1.0 }
 0x116   :  { %v707_v58 = vmax.f32 %v669_v53, 1.0 }
 0x117   :  { %1164 = vrcp.f32 %v708_v52 }
 0x118   :  { %v678_v55 = vpop.xlane.xlu0 %677  ;;  %1166 = vrcp.f32 %v707_v58 }
 0x119   :  { %v681_v61 = vpop.xlane.xlu1 %680  ;;  %v685_v51 = vsub.f32 %v666_v46, %v678_v55  ;;  %1168 = vrcp.f32 %v706_v59  ;;  %v700_v4 = vmul.f32 %v699_v0, %v678_v55 }
 0x11a   :  { %v686_v1 = vsub.f32 %v669_v53, %v681_v61  ;;  %v701_v62 = vmul.f32 %v699_v0, %v681_v61 }
 0x11b   :  { %v693_v48 = vmul.f32 %v692_v63, %v685_v51 }
 0x11c   :  { %v684_v56 = vpop.xlane.xlu0 %683  ;;  %v694_v12 = vmul.f32 %v692_v63, %v686_v1 }
 0x11d   :  { %v687_v60 = vsub.f32 %v672_v54, %v684_v56  ;;  %v702_v9 = vmul.f32 %v699_v0, %v684_v56  ;;  %v703_v14 = vadd.f32 %v700_v4, %v693_v48 }
 0x11e   :  { %v704_v5 = vadd.f32 %v701_v62, %v694_v12 }
 0x11f   :  { %v695_v3 = vmul.f32 %v692_v63, %v687_v60 }
 0x121   :  { %v705_v13 = vadd.f32 %v702_v9, %v695_v3  ;;  %v1165_v17 = vpop.eup %1164 }
 0x122   :  { %v1167_v6 = vpop.eup %1166 }
 0x123   :  { %v1169_v21 = vpop.eup %1168 }
 0x1c1   :  { %v1125_v10 = vpop.f32.mrb[0].mxu0 }
 0x1c2   :  { %v883_v15 = vadd.f32 %v1125_v10, %v705_v13  ;;  %v874_v16 = vpop.f32.mrb[1].mxu0 }
 0x1c3   :  { %v875_v19 = vadd.f32 %v874_v16, %v703_v14  ;;  %v1126_v7 = vpop.f32.mrb[2].mxu0 }
 0x1c4   :  { %v877_v11 = vpop.f32.mrb[3].mxu0  ;;  %v890_v23 = vmul.f32 %v1165_v17, %v883_v15 }
 0x1c5   :  { %v878_v20 = vadd.f32 %v877_v11, %v704_v5  ;;  %v888_v22 = vmul.f32 %v1169_v21, %v875_v19 }
 0x1c6   :  { %v892_v24 = vpack.c.bf16 %v890_v23, %v890_v23 }
 0x1c7   :  { %v889_v25 = vmul.f32 %v1167_v6, %v878_v20 }
 0x1c9   :  { %v891_v49 = vpack.c.bf16 %v889_v25, %v888_v22 }
 0x1cb   :  { %1143 = vmatprep.mubr.bf16.mxu1 %v891_v49 }
 0x1cc   :  { %1144 = vmatmul.mubr.bf16.vlgmr.msra.gmra.mrb[0].mxu1 %v892_v24 }
 0x29f   :  { %v1145_v27 = vpop.f32.mrb[0].mxu1 }
 0x2a0   :  { %v1007_v28 = vadd.f32 %v1145_v27, %v1078_v26  ;;  %v998_v18 = vpop.f32.mrb[1].mxu1 }
 0x2a1   :  { %v999_v29 = vadd.f32 %v1078_v26, %v998_v18  ;;  %v1146_v2 = vpop.f32.mrb[2].mxu1 }
 0x2a2   :  { %1170 = vtanh.f32 %v1007_v28  ;;  %v1001_v30 = vpop.f32.mrb[3].mxu1 }
 0x2a3   :  { %1172 = vtanh.f32 %v999_v29  ;;  %v1002_v31 = vadd.f32 %v1078_v26, %v1001_v30 }
 0x2a5   :  { %1174 = vtanh.f32 %v1002_v31 }
 0x2ac   :  { %v1171_v32 = vpop.eup %1170 }
 0x2ad   :  { %v1173_v33 = vpop.eup %1172  ;;  %1017 = vst [vmem:[%s1557_s7 + $0x10] sm:$0xff] %v1171_v32 }
 0x2ae   :  { %1015 = vst [vmem:[%s1557_s7] sm:$0xff] %v1173_v33 }
 0x2af   :  { %v1175_v8 = vpop.eup %1174 }
 0x2b0   :  { %1016 = vst [vmem:[%s1557_s7 + $0x8] sm:$0xff] %v1175_v8 }

// kernel: ranker_gear_forward.3
= control target key start
LH: loop header
LB: loop body
LE: loop exit
PB: predicated region body
PF: predicated region fallthrough
CT: control target
= control target key end

     0   :  { %v87_v16 = vlaneseq  ;;  %vm121_vm0 = vcmask 1041409   ;;  %vm123_vm1 = vcmask 1042434   ;;  %vm125_vm2 = vcmask 1043459   ;;  %s2285_s0 = inlined_call_operand.vmem [shape: f32[8,8,128], index: 0, kind: input, shape index: {}]   ;;  %s2286_s9 = inlined_call_operand.vmem [shape: f32[8,8], index: 9, kind: output, shape index: {0}]   ;;  %s2287_s2 = inlined_call_operand.vmem [shape: bf16[128,64], index: 2, kind: input, shape index: {}]   ;;  %s2288_s3 = inlined_call_operand.vmem [shape: bf16[128,64], index: 3, kind: input, shape index: {}]   ;;  %s2289_s1 = inlined_call_operand.vmem [shape: f32[8,128], index: 1, kind: input, shape index: {}]   ;;  %s2290_s6 = inlined_call_operand.<no memory space> [shape: f32[1,1], index: 6, kind: input, shape index: {}]   ;;  %s2291_s4 = inlined_call_operand.vmem [shape: f32[1,64], index: 4, kind: input, shape index: {}]   ;;  %s2292_s5 = inlined_call_operand.vmem [shape: f32[1,64], index: 5, kind: input, shape index: {}]   ;;  %s2293_s7 = inlined_call_operand.vmem [shape: bf16[128,3], index: 7, kind: input, shape index: {}]   ;;  %s2294_s8 = inlined_call_operand.vmem [shape: f32[1,3], index: 8, kind: input, shape index: {}]   ;;  %s2295_s10 = inlined_call_operand.vmem [shape: f32[8,3], index: 10, kind: output, shape index: {1}]  }
   0x1   :  { %v1835_v0 = vld [vmem:[%s2285_s0] sm:$0xff]  ;;  %v1840_v1 = vld [vmem:[%s2285_s0 + $0x10] sm:$0xff]  ;;  %v1845_v2 = vld [vmem:[%s2285_s0 + $0x8] sm:$0xff]  ;;  %vm127_vm3 = vcmask 1044484   ;;  %vm129_vm4 = vcmask 1045509   ;;  %vm131_vm5 = vcmask 1046534  }
   0x2   :  { %v46_v3 = vmax.f32 %v1835_v0, 0.0  ;;  %v48_v4 = vmax.f32 %v1840_v1, 0.0  ;;  %v1852_v5 = vld [vmem:[%s2285_s0 + $0x18] sm:$0xff]  ;;  %v47_v6 = vmax.f32 %v1845_v2, 0.0  ;;  %v1859_v8 = vld [vmem:[%s2285_s0 + $0x20] sm:$0xff]  ;;  %v1864_v9 = vld [vmem:[%s2285_s0 + $0x28] sm:$0xff] }
   0x3   :  { %v49_v7 = vmax.f32 %v1852_v5, 0.0  ;;  %v50_v10 = vmax.f32 %v1859_v8, 0.0  ;;  %v51_v11 = vmax.f32 %v1864_v9, 0.0  ;;  %v1871_v12 = vld [vmem:[%s2285_s0 + $0x30] sm:$0xff]  ;;  %v1876_v13 = vld [vmem:[%s2285_s0 + $0x38] sm:$0xff]  ;;  %v1880_v17 = vand.u32 127, %v87_v16 }
   0x4   :  { %54 = vadd.xlane.f32.xlu0 %v46_v3  ;;  %58 = vadd.xlane.f32.xlu1 %v48_v4  ;;  %v52_v14 = vmax.f32 %v1871_v12, 0.0  ;;  %v53_v15 = vmax.f32 %v1876_v13, 0.0  ;;  %v1882_v18 = vshrl.u32 %v87_v16, 7  ;;  %vm133_vm6 = vcmask 1047559  }
   0x5   :  { %vm136_vm7 = vcmask 64512   ;;  %v1773_v52 = vmov 0  }
   0x6   :  { %v1886_v21 = vsub.s32 %v1880_v17, %v1882_v18  ;;  %1708 = vset.pattern.permute.xlu0 %v1773_v52  ;;  %1707 = vset.pattern.permute.xlu1 %v1773_v52  ;;  %v1905_v53 = vsub.s32 0, %v1882_v18  ;;  %v1908_v54 = vsub.s32 1, %v1882_v18  ;;  %v1911_v55 = vsub.s32 2, %v1882_v18 }
   0x7   :  { %v1914_v56 = vsub.s32 3, %v1882_v18  ;;  %v1920_v61 = vsub.s32 4, %v1882_v18  ;;  %v1928_v16 = vsub.s32 6, %v1882_v18 }
   0x8   :  { %56 = vadd.xlane.f32.xlu0 %v47_v6  ;;  %60 = vadd.xlane.f32.xlu1 %v49_v7 }
   0xc   :  { %62 = vadd.xlane.f32.xlu0 %v50_v10  ;;  %64 = vadd.xlane.f32.xlu1 %v51_v11  ;;  %v1924_v10 = vsub.s32 5, %v1882_v18 }
  0x10   :  { %66 = vadd.xlane.f32.xlu0 %v52_v14  ;;  %68 = vadd.xlane.f32.xlu1 %v53_v15 }
  0x91   :  { %v55_v19 = vpop.xlane.xlu0 %54  ;;  %v59_v20 = vpop.xlane.xlu1 %58 }
  0x92   :  { %v71_v22 = vmul.f32 0.0078125, %v55_v19  ;;  %v73_v23 = vmul.f32 0.0078125, %v59_v20 }
  0x94   :  { %v92_v28 = vrot.slane %v71_v22, %v1886_v21  ;;  %v100_v31 = vrot.slane %v73_v23, %v1886_v21 }
  0x95   :  { %v57_v24 = vpop.xlane.xlu0 %56  ;;  %v61_v25 = vpop.xlane.xlu1 %60 }
  0x96   :  { %v72_v26 = vmul.f32 0.0078125, %v57_v24  ;;  %v74_v27 = vmul.f32 0.0078125, %v61_v25 }
  0x98   :  { %v96_v29 = vrot.slane %v72_v26, %v1886_v21  ;;  %v104_v30 = vrot.slane %v74_v27, %v1886_v21 }
  0x99   :  { %v63_v32 = vpop.xlane.xlu0 %62  ;;  %v65_v33 = vpop.xlane.xlu1 %64 }
  0x9a   :  { %v122_v34 = vsel %vm121_vm0, %v96_v29, %v92_v28  ;;  %v75_v35 = vmul.f32 0.0078125, %v63_v32  ;;  %v76_v36 = vmul.f32 0.0078125, %v65_v33 }
  0x9b   :  { %v124_v37 = vsel %vm123_vm1, %v100_v31, %v122_v34 }
  0x9c   :  { %v126_v38 = vsel %vm125_vm2, %v104_v30, %v124_v37  ;;  %v108_v39 = vrot.slane %v75_v35, %v1886_v21  ;;  %v112_v40 = vrot.slane %v76_v36, %v1886_v21 }
  0x9d   :  { %v67_v41 = vpop.xlane.xlu0 %66  ;;  %v69_v42 = vpop.xlane.xlu1 %68 }
  0x9e   :  { %v128_v43 = vsel %vm127_vm3, %v108_v39, %v126_v38  ;;  %v77_v44 = vmul.f32 0.0078125, %v67_v41  ;;  %v78_v45 = vmul.f32 0.0078125, %v69_v42 }
  0x9f   :  { %v130_v48 = vsel %vm129_vm4, %v112_v40, %v128_v43 }
  0xa0   :  { %v116_v46 = vrot.slane %v77_v44, %v1886_v21  ;;  %v120_v47 = vrot.slane %v78_v45, %v1886_v21 }
  0xa2   :  { %v132_v49 = vsel %vm131_vm5, %v116_v46, %v130_v48 }
  0xa3   :  { %v134_v50 = vsel %vm133_vm6, %v120_v47, %v132_v49 }
  0xa4   :  { %v137_v51 = vsel %vm136_vm7, %v134_v50, -inf }
  0xa5   :  { %138 = vmax.xlane.f32.xlu0 %v137_v51 }
 0x132   :  { %v139_v57 = vpop.xlane.xlu0 %138 }
 0x133   :  { %v144_v58 = vrot.slane %v139_v57, %v1905_v53  ;;  %v148_v59 = vrot.slane %v139_v57, %v1908_v54  ;;  %v152_v60 = vrot.slane %v139_v57, %v1911_v55  ;;  %v156_v62 = vrot.slane %v139_v57, %v1914_v56 }
 0x134   :  { %v160_v11 = vrot.slane %v139_v57, %v1920_v61  ;;  %v164_v19 = vrot.slane %v139_v57, %v1924_v10  ;;  %v168_v24 = vrot.slane %v139_v57, %v1928_v16 }
 0x135   :  { %v181_v63 = vsub.f32 %v71_v22, %v144_v58  ;;  %v182_v3 = vsub.f32 %v72_v26, %v148_v59  ;;  %v183_v4 = vsub.f32 %v73_v23, %v152_v60  ;;  %v184_v14 = vsub.f32 %v74_v27, %v156_v62 }
 0x136   :  { %v185_v20 = vsub.f32 %v75_v35, %v160_v11  ;;  %v1932_v23 = vsub.s32 7, %v1882_v18  ;;  %v186_v25 = vsub.f32 %v76_v36, %v164_v19  ;;  %v187_v30 = vsub.f32 %v77_v44, %v168_v24 }
 0x137   :  { %v189_v6 = vmul.f32 1.442695, %v181_v63  ;;  %v191_v7 = vmul.f32 1.442695, %v182_v3  ;;  %v193_v15 = vmul.f32 1.442695, %v183_v4 }
 0x138   :  { %v195_v22 = vmul.f32 1.442695, %v184_v14  ;;  %v197_v26 = vmul.f32 1.442695, %v185_v20  ;;  %v172_v29 = vrot.slane %v139_v57, %v1932_v23  ;;  %v199_v31 = vmul.f32 1.442695, %v186_v25 }
 0x139   :  { %1733 = vpow2.f32 %v189_v6  ;;  %v201_v34 = vmul.f32 1.442695, %v187_v30 }
 0x13a   :  { %1735 = vpow2.f32 %v191_v7  ;;  %v188_v33 = vsub.f32 %v78_v45, %v172_v29 }
 0x13b   :  { %1737 = vpow2.f32 %v193_v15 }
 0x13c   :  { %1739 = vpow2.f32 %v195_v22  ;;  %v203_v36 = vmul.f32 1.442695, %v188_v33 }
 0x13d   :  { %1741 = vpow2.f32 %v197_v26 }
 0x13e   :  { %1743 = vpow2.f32 %v199_v31 }
 0x13f   :  { %1745 = vpow2.f32 %v201_v34 }
 0x140   :  { %1747 = vpow2.f32 %v203_v36 }
 0x143   :  { %v1734_v27 = vpop.eup %1733 }
 0x144   :  { %v1736_v28 = vpop.eup %1735  ;;  %214 = vperm.xlu1 %1707, %v1734_v27  }
 0x145   :  { %217 = vperm.xlu0 %1708, %v1736_v28   ;;  %v1738_v32 = vpop.eup %1737 }
 0x146   :  { %v1740_v35 = vpop.eup %1739 }
 0x147   :  { %v1742_v37 = vpop.eup %1741 }
 0x148   :  { %220 = vperm.xlu1 %1707, %v1738_v32   ;;  %v1744_v38 = vpop.eup %1743 }
 0x149   :  { %v1746_v39 = vpop.eup %1745 }
 0x14a   :  { %v1748_v40 = vpop.eup %1747 }
 0x14c   :  { %223 = vperm.xlu1 %1707, %v1740_v35  }
 0x150   :  { %226 = vperm.xlu1 %1707, %v1742_v37  }
 0x154   :  { %229 = vperm.xlu1 %1707, %v1744_v38  }
 0x158   :  { %232 = vperm.xlu1 %1707, %v1746_v39  }
 0x15c   :  { %235 = vperm.xlu1 %1707, %v1748_v40  }
 0x1c3   :  { %v215_v41 = vpop.permute.xlu1 %214 }
 0x1c4   :  { %v218_v45 = vpop.permute.xlu0 %217  ;;  %v240_v48 = vrot.slane %v215_v41, %v1886_v21 }
 0x1c5   :  { %v244_v47 = vrot.slane %v218_v45, %v1886_v21 }
 0x1c7   :  { %v221_v42 = vpop.permute.xlu1 %220  ;;  %v269_v57 = vsel %vm121_vm0, %v244_v47, %v240_v48 }
 0x1c8   :  { %v248_v49 = vrot.slane %v221_v42, %v1886_v21 }
 0x1ca   :  { %v270_v59 = vsel %vm123_vm1, %v248_v49, %v269_v57 }
 0x1cb   :  { %v224_v43 = vpop.permute.xlu1 %223 }
 0x1cc   :  { %v252_v50 = vrot.slane %v224_v43, %v1886_v21 }
 0x1ce   :  { %v271_v62 = vsel %vm125_vm2, %v252_v50, %v270_v59 }
 0x1cf   :  { %v227_v44 = vpop.permute.xlu1 %226 }
 0x1d0   :  { %v256_v51 = vrot.slane %v227_v44, %v1886_v21 }
 0x1d2   :  { %v272_v63 = vsel %vm127_vm3, %v256_v51, %v271_v62 }
 0x1d3   :  { %v230_v46 = vpop.permute.xlu1 %229 }
 0x1d4   :  { %v260_v58 = vrot.slane %v230_v46, %v1886_v21 }
 0x1d6   :  { %v273_v4 = vsel %vm129_vm4, %v260_v58, %v272_v63 }
 0x1d7   :  { %v233_v52 = vpop.permute.xlu1 %232 }
 0x1d8   :  { %v264_v60 = vrot.slane %v233_v52, %v1886_v21 }
 0x1da   :  { %v274_v7 = vsel %vm131_vm5, %v264_v60, %v273_v4 }
 0x1db   :  { %v236_v3 = vpop.permute.xlu1 %235 }
 0x1dc   :  { %v268_v6 = vrot.slane %v236_v3, %v1886_v21 }
 0x1de   :  { %v275_v11 = vsel %vm133_vm6, %v268_v6, %v274_v7 }
 0x1df   :  { %v277_v14 = vsel %vm136_vm7, %v275_v11, 0.0 }
 0x1e0   :  { %278 = vadd.xlane.f32.xlu1 %v277_v14 }
 0x26d   :  { %v279_v15 = vpop.xlane.xlu1 %278 }
 0x26e   :  { %1749 = vrcp.f32 %v279_v15 }
 0x278   :  { %v1750_v19 = vpop.eup %1749 }
 0x279   :  { %v285_v20 = vrot.slane %v1750_v19, %v1905_v53  ;;  %v289_v24 = vrot.slane %v1750_v19, %v1908_v54  ;;  %v293_v26 = vrot.slane %v1750_v19, %v1911_v55  ;;  %v297_v30 = vrot.slane %v1750_v19, %v1914_v56 }
 0x27a   :  { %v301_v33 = vrot.slane %v1750_v19, %v1920_v61  ;;  %v305_v36 = vrot.slane %v1750_v19, %v1924_v10 }
 0x27b   :  { %v322_v22 = vmul.f32 %v1734_v27, %v285_v20  ;;  %v323_v25 = vmul.f32 %v1736_v28, %v289_v24  ;;  %v324_v29 = vmul.f32 %v1738_v32, %v293_v26  ;;  %v325_v31 = vmul.f32 %v1740_v35, %v297_v30 }
 0x27c   :  { %v1957_v34 = vmul.f32 %v1742_v37, %v301_v33  ;;  %v327_v27 = vmul.f32 %v1744_v38, %v305_v36  ;;  %v309_v28 = vrot.slane %v1750_v19, %v1928_v16  ;;  %v313_v32 = vrot.slane %v1750_v19, %v1932_v23 }
 0x27d   :  { %339 = vperm.xlu0 %1708, %v322_v22  }
 0x27e   :  { %v1962_v41 = vmul.f32 %v1746_v39, %v309_v28  ;;  %v329_v35 = vmul.f32 %v1748_v40, %v313_v32 }
 0x281   :  { %342 = vperm.xlu0 %1708, %v323_v25  }
 0x285   :  { %345 = vperm.xlu0 %1708, %v324_v29  }
 0x289   :  { %348 = vperm.xlu0 %1708, %v325_v31  }
 0x28d   :  { %351 = vperm.xlu0 %1708, %v1957_v34  }
 0x291   :  { %354 = vperm.xlu0 %1708, %v327_v27  }
 0x295   :  { %357 = vperm.xlu0 %1708, %v1962_v41  }
 0x299   :  { %360 = vperm.xlu0 %1708, %v329_v35  }
 0x29d   :  { %456 = vbcast.lane.b32.xlu0 %v1880_v17, 256 }
 0x2fc   :  { %v340_v37 = vpop.permute.xlu0 %339 }
 0x2fd   :  { %v365_v39 = vrot.slane %v340_v37, %v1886_v21 }
 0x300   :  { %v343_v42 = vpop.permute.xlu0 %342 }
 0x301   :  { %v369_v38 = vrot.slane %v343_v42, %v1886_v21 }
 0x303   :  { %v394_v50 = vsel %vm121_vm0, %v369_v38, %v365_v39 }
 0x304   :  { %v346_v43 = vpop.permute.xlu0 %345 }
 0x305   :  { %v373_v47 = vrot.slane %v346_v43, %v1886_v21 }
 0x307   :  { %v395_v52 = vsel %vm123_vm1, %v373_v47, %v394_v50 }
 0x308   :  { %v349_v44 = vpop.permute.xlu0 %348 }
 0x309   :  { %v377_v48 = vrot.slane %v349_v44, %v1886_v21 }
 0x30b   :  { %v396_v58 = vsel %vm125_vm2, %v377_v48, %v395_v52 }
 0x30c   :  { %v352_v45 = vpop.permute.xlu0 %351 }
 0x30d   :  { %v381_v49 = vrot.slane %v352_v45, %v1886_v21 }
 0x30f   :  { %v397_v59 = vsel %vm127_vm3, %v381_v49, %v396_v58 }
 0x310   :  { %v355_v46 = vpop.permute.xlu0 %354 }
 0x311   :  { %v385_v51 = vrot.slane %v355_v46, %v1886_v21 }
 0x313   :  { %v398_v62 = vsel %vm129_vm4, %v385_v51, %v397_v59 }
 0x314   :  { %v358_v40 = vpop.permute.xlu0 %357 }
 0x315   :  { %v389_v57 = vrot.slane %v358_v40, %v1886_v21 }
 0x317   :  { %v399_v3 = vsel %vm131_vm5, %v389_v57, %v398_v62 }
 0x318   :  { %v361_v60 = vpop.permute.xlu0 %360 }
 0x319   :  { %v393_v63 = vrot.slane %v361_v60, %v1886_v21 }
 0x31b   :  { %v1982_v4 = vsel %vm133_vm6, %v393_v63, %v399_v3 }
 0x31c   :  { %402 = vst.msk [vmem:[%s2286_s9] sm:$0xff] %vm136_vm7, %v1982_v4  ;;  %v403_v6 = vsel %vm136_vm7, %v1982_v4, -inf  ;;  %v457_v11 = vpop.permute.xlu0 %456 }
 0x31d   :  { %404 = vmax.xlane.f32.xlu1 %v403_v6 }
 0x3aa   :  { %v405_v7 = vpop.xlane.xlu1 %404 }
 0x3ab   :  { %v414_v14 = vrot.slane %v405_v7, %v1908_v54  ;;  %v410_v15 = vrot.slane %v405_v7, %v1905_v53  ;;  %v418_v19 = vrot.slane %v405_v7, %v1911_v55  ;;  %v430_v20 = vrot.slane %v405_v7, %v1924_v10 }
 0x3ac   :  { %v422_v30 = vrot.slane %v405_v7, %v1914_v56  ;;  %v438_v33 = vrot.slane %v405_v7, %v1932_v23  ;;  %v426_v32 = vrot.slane %v405_v7, %v1920_v61  ;;  %v434_v37 = vrot.slane %v405_v7, %v1928_v16 }
 0x3ad   :  { %vm448_vm8 = vcmp.eq.f32.partialorder %v323_v25, %v414_v14  ;;  %vm447_vm9 = vcmp.eq.f32.partialorder %v322_v22, %v410_v15  ;;  %vm449_vm10 = vcmp.eq.f32.partialorder %v324_v29, %v418_v19  ;;  %vm452_vm11 = vcmp.eq.f32.partialorder %v327_v27, %v430_v20 }
 0x3ae   :  { %v459_v24 = vsel %vm448_vm8, %v457_v11, 8  ;;  %v458_v26 = vsel %vm447_vm9, %v457_v11, 8  ;;  %v460_v36 = vsel %vm449_vm10, %v457_v11, 8  ;;  %v463_v28 = vsel %vm452_vm11, %v457_v11, 8 }
 0x3af   :  { %470 = vperm.xlu0 %1708, %v459_v24   ;;  %467 = vperm.xlu1 %1707, %v458_v26   ;;  %vm450_vm12 = vcmp.eq.f32.partialorder %v325_v31, %v422_v30  ;;  %vm454_vm13 = vcmp.eq.f32.partialorder %v329_v35, %v438_v33  ;;  %vm451_vm14 = vcmp.eq.f32.partialorder %v1957_v34, %v426_v32 }
 0x3b0   :  { %v461_v25 = vsel %vm450_vm12, %v457_v11, 8  ;;  %v465_v22 = vsel %vm454_vm13, %v457_v11, 8  ;;  %v462_v29 = vsel %vm451_vm14, %v457_v11, 8  ;;  %vm453_vm15 = vcmp.eq.f32.partialorder %v1962_v41, %v434_v37 }
 0x3b1   :  { %v464_v27 = vsel %vm453_vm15, %v457_v11, 8 }
 0x3b3   :  { %473 = vperm.xlu0 %1708, %v460_v36   ;;  %482 = vperm.xlu1 %1707, %v463_v28  }
 0x3b7   :  { %476 = vperm.xlu0 %1708, %v461_v25   ;;  %488 = vperm.xlu1 %1707, %v465_v22  }
 0x3bb   :  { %479 = vperm.xlu0 %1708, %v462_v29  }
 0x3bf   :  { %485 = vperm.xlu0 %1708, %v464_v27  }
 0x42e   :  { %v471_v42 = vpop.permute.xlu0 %470  ;;  %v468_v43 = vpop.permute.xlu1 %467 }
 0x42f   :  { %v497_v35 = vrot.slane %v471_v42, %v1886_v21  ;;  %v493_v44 = vrot.slane %v468_v43, %v1886_v21 }
 0x431   :  { %v522_v47 = vsel %vm121_vm0, %v497_v35, %v493_v44 }
 0x432   :  { %v474_v31 = vpop.permute.xlu0 %473  ;;  %v483_v38 = vpop.permute.xlu1 %482 }
 0x433   :  { %v501_v46 = vrot.slane %v474_v31, %v1886_v21  ;;  %v513_v51 = vrot.slane %v483_v38, %v1886_v21 }
 0x435   :  { %v523_v41 = vsel %vm123_vm1, %v501_v46, %v522_v47 }
 0x436   :  { %v477_v45 = vpop.permute.xlu0 %476  ;;  %v489_v40 = vpop.permute.xlu1 %488 }
 0x437   :  { %v505_v34 = vrot.slane %v477_v45, %v1886_v21  ;;  %v521_v58 = vrot.slane %v489_v40, %v1886_v21 }
 0x439   :  { %v524_v49 = vsel %vm125_vm2, %v505_v34, %v523_v41 }
 0x43a   :  { %v480_v39 = vpop.permute.xlu0 %479 }
 0x43b   :  { %v509_v48 = vrot.slane %v480_v39, %v1886_v21 }
 0x43d   :  { %v525_v50 = vsel %vm127_vm3, %v509_v48, %v524_v49 }
 0x43e   :  { %v486_v52 = vpop.permute.xlu0 %485  ;;  %v526_v59 = vsel %vm129_vm4, %v513_v51, %v525_v50 }
 0x43f   :  { %v517_v57 = vrot.slane %v486_v52, %v1886_v21 }
 0x441   :  { %v527_v60 = vsel %vm131_vm5, %v517_v57, %v526_v59  ;;  %v1774_v57 = vmov 0.0   ;;  %v1710_v59 = vld [vmem:[%s2287_s2 + $0x8] sm:$0xff]  }
 0x442   :  { %v528_v62 = vsel %vm133_vm6, %v521_v58, %v527_v60  ;;  %1663 = vmatprep.subr.bf16.mxu1 %v1774_v57  ;;  %v1709_v58 = vld [vmem:[%s2287_s2] sm:$0xff]  }
 0x443   :  { %v529_v63 = vsel %vm136_vm7, %v528_v62, 2147483647  ;;  %1664 = vmatpush3.bf16.msra.mxu1 %v1709_v58  ;;  %v1711_v60 = vld [vmem:[%s2288_s3] sm:$0xff]   ;;  %v1713_v62 = vld [vmem:[%s2288_s3 + $0x8] sm:$0xff]  }
 0x444   :  { %v531_v3 = vshra.s32 %v529_v63, 16  ;;  %v530_v7 = vand.u32 65535, %v529_v63  ;;  %1665 = vmatprep.subr.bf16.mxu1 %v1774_v57  ;;  %1639 = vmatprep.subr.bf16.mxu0 %v1711_v60  ;;  %v1712_v63 = vld [vmem:[%s2287_s2 + $0x10] sm:$0xff]  }
 0x445   :  { %1640 = vmatpush3.bf16.msra.mxu0 %v1711_v60 }
 0x446   :  { %v533_v6 = vcvt.s32.f32 %v531_v3  ;;  %v532_v14 = vcvt.s32.f32 %v530_v7  ;;  %1641 = vmatprep.subr.bf16.mxu0 %v1713_v62  ;;  %v1715_v3 = vld [vmem:[%s2288_s3 + $0x10] sm:$0xff]   ;;  %v1717_v7 = vld [vmem:[%s2288_s3 + $0x18] sm:$0xff]  }
 0x447   :  { %1666 = vmatpush3.bf16.msra.mxu1 %v1710_v59 }
 0x448   :  { %534 = vmin.xlane.f32.xlu0 %v533_v6  ;;  %1667 = vmatprep.subr.bf16.mxu1 %v1774_v57 }
 0x449   :  { %1642 = vmatpush3.bf16.msra.mxu0 %v1713_v62 }
 0x44a   :  { %1643 = vmatprep.subr.bf16.mxu0 %v1715_v3 }
 0x44b   :  { %1668 = vmatpush3.bf16.msra.mxu1 %v1712_v63 }
 0x44c   :  { %1669 = vmatprep.subr.bf16.mxu1 %v1774_v57 }
 0x44d   :  { %1644 = vmatpush3.bf16.msra.mxu0 %v1715_v3 }
 0x44e   :  { %1645 = vmatprep.subr.bf16.mxu0 %v1717_v7 }
 0x451   :  { %1646 = vmatpush3.bf16.msra.mxu0 %v1717_v7 }
 0x4d5   :  { %v535_v11 = vpop.xlane.xlu0 %534 }
 0x4d6   :  { %vm536_vm8 = vcmp.eq.f32.partialorder %v533_v6, %v535_v11  ;;  %v541_v19 = vcvt.f32.s32 %v535_v11  ;;  %v1714_v6 = vld [vmem:[%s2287_s2 + $0x18] sm:$0xff]   ;;  %v1716_v11 = vld [vmem:[%s2287_s2 + $0x20] sm:$0xff]  }
 0x4d7   :  { %v537_v15 = vsel %vm536_vm8, %v532_v14, inf  ;;  %1670 = vmatpush3.bf16.msra.mxu1 %v1714_v6  ;;  %v1719_v14 = vld [vmem:[%s2288_s3 + $0x20] sm:$0xff]   ;;  %vm1775_vm8 = vmmov 0  }
 0x4d8   :  { %538 = vmin.xlane.f32.xlu1 %v537_v15  ;;  %v542_v24 = vshll.u32 %v541_v19, 16  ;;  %1671 = vmatprep.subr.bf16.mxu1 %v1774_v57  ;;  %v1718_v15 = vld [vmem:[%s2287_s2 + $0x28] sm:$0xff]   ;;  %v1720_v19 = vld [vmem:[%s2287_s2 + $0x30] sm:$0xff]  }
 0x4d9   :  { %1647 = vmatprep.subr.bf16.mxu0 %v1719_v14  ;;  %1679 = vmatprep.mubr.msk.bf16.mxu1 %vm1775_vm8, %v1774_v57 }
 0x4da   :  { %1648 = vmatpush3.bf16.msra.mxu0 %v1719_v14  ;;  %v1776_v14 = vmov 1966171168  }
 0x4db   :  { %1672 = vmatpush3.bf16.msra.mxu1 %v1716_v11 }
 0x4dc   :  { %1673 = vmatprep.subr.bf16.mxu1 %v1774_v57 }
 0x4df   :  { %1674 = vmatpush3.bf16.msra.mxu1 %v1718_v15 }
 0x4e0   :  { %1675 = vmatprep.subr.bf16.mxu1 %v1774_v57 }
 0x4e3   :  { %1676 = vmatpush3.bf16.msra.mxu1 %v1720_v19 }
 0x4e4   :  { %1677 = vmatprep.subr.bf16.mxu1 %v1774_v57 }
 0x565   :  { %v539_v20 = vpop.xlane.xlu1 %538 }
 0x566   :  { %v540_v26 = vcvt.f32.s32 %v539_v20 }
 0x568   :  { %v2017_v30 = vadd.s32 %v542_v24, %v540_v26  ;;  %v1721_v24 = vld [vmem:[%s2288_s3 + $0x28] sm:$0xff]   ;;  %v1722_v26 = vld [vmem:[%s2287_s2 + $0x38] sm:$0xff]  }
 0x569   :  { %1649 = vmatprep.subr.bf16.mxu0 %v1721_v24  ;;  %1678 = vmatpush3.bf16.msra.mxu1 %v1722_v26 }
 0x56a   :  { %vm544_vm9 = vcmp.eq.s32.totalorder %v1880_v17, %v2017_v30  ;;  %1650 = vmatpush3.bf16.msra.mxu0 %v1721_v24 }
 0x56b   :  { %v547_v33 = vsel %vm544_vm9, -inf, %v1982_v4 }
 0x56c   :  { %v548_v36 = vsel %vm136_vm7, %v547_v33, -inf }
 0x56d   :  { %549 = vmax.xlane.f32.xlu0 %v548_v36 }
 0x5fa   :  { %v550_v28 = vpop.xlane.xlu0 %549 }
 0x5fb   :  { %vm551_vm10 = vcmp.eq.f32.partialorder %v547_v33, %v550_v28 }
 0x5fc   :  { %v552_v32 = vsel %vm551_vm10, %v1880_v17, 8 }
 0x5fd   :  { %v553_v25 = vsel %vm136_vm7, %v552_v32, 2147483647 }
 0x5fe   :  { %v555_v22 = vshra.s32 %v553_v25, 16  ;;  %v554_v29 = vand.u32 65535, %v553_v25  ;;  %v1723_v25 = vld [vmem:[%s2288_s3 + $0x30] sm:$0xff]  }
 0x5ff   :  { %1651 = vmatprep.subr.bf16.mxu0 %v1723_v25 }
 0x600   :  { %v557_v37 = vcvt.s32.f32 %v555_v22  ;;  %v556_v42 = vcvt.s32.f32 %v554_v29  ;;  %v545_v29 = vsel %vm544_vm9, %v1982_v4, 0.0  ;;  %1652 = vmatpush3.bf16.msra.mxu0 %v1723_v25 }
 0x602   :  { %558 = vmin.xlane.f32.xlu0 %v557_v37 }
 0x68f   :  { %v559_v27 = vpop.xlane.xlu0 %558 }
 0x690   :  { %vm560_vm11 = vcmp.eq.f32.partialorder %v557_v37, %v559_v27  ;;  %v565_v31 = vcvt.f32.s32 %v559_v27  ;;  %v45_v37 = vld [vmem:[%s2289_s1] sm:$0xff] }
 0x691   :  { %v561_v43 = vsel %vm560_vm11, %v556_v42, inf  ;;  %v793_v27 = vpack.c.bf16 %v45_v37, %v45_v37 }
 0x692   :  { %562 = vmin.xlane.f32.xlu1 %v561_v43  ;;  %v566_v44 = vshll.u32 %v565_v31, 16 }
 0x693   :  { %1680 = vmatmul.mubr.bf16.vlgmr.msra.gmra.mrb[0].mxu1 %v793_v27 }
 0x71f   :  { %v563_v35 = vpop.xlane.xlu1 %562 }
 0x720   :  { %v564_v45 = vcvt.f32.s32 %v563_v35  ;;  %v1724_v35 = vld [vmem:[%s2288_s3 + $0x38] sm:$0xff]  }
 0x721   :  { %1653 = vmatprep.subr.bf16.mxu0 %v1724_v35 }
 0x722   :  { %v2028_v46 = vadd.s32 %v566_v44, %v564_v45  ;;  %1654 = vmatpush3.bf16.msra.mxu0 %v1724_v35 }
 0x723   :  { %1683 = vmatprep.subr.bf16.mxu0 %v1774_v57 }
 0x724   :  { %vm568_vm12 = vcmp.eq.s32.totalorder %v1880_v17, %v2028_v46 }
 0x725   :  { %vm569_vm13 = vmor %vm544_vm9, %vm568_vm12  ;;  %v570_v32 = vsel %vm568_vm12, %v1982_v4, 0.0  ;;  %vm1034_vm9 = vcmask 523264  }
 0x726   :  { %v572_v38 = vsel %vm569_vm13, -inf, %v1982_v4  ;;  %v571_v42 = vadd.f32 %v570_v32, %v545_v29 }
 0x727   :  { %v573_v34 = vsel %vm136_vm7, %v572_v38, -inf }
 0x728   :  { %574 = vmax.xlane.f32.xlu0 %v573_v34 }
 0x7b5   :  { %v575_v47 = vpop.xlane.xlu0 %574 }
 0x7b6   :  { %vm576_vm14 = vcmp.eq.f32.partialorder %v572_v38, %v575_v47 }
 0x7b7   :  { %v577_v39 = vsel %vm576_vm14, %v1880_v17, 8 }
 0x7b8   :  { %v578_v41 = vsel %vm136_vm7, %v577_v39, 2147483647 }
 0x7b9   :  { %v580_v48 = vshra.s32 %v578_v41, 16  ;;  %v579_v40 = vand.u32 65535, %v578_v41 }
 0x7bb   :  { %v582_v49 = vcvt.s32.f32 %v580_v48  ;;  %v581_v51 = vcvt.s32.f32 %v579_v40 }
 0x7bd   :  { %583 = vmin.xlane.f32.xlu1 %v582_v49 }
 0x84a   :  { %v584_v50 = vpop.xlane.xlu1 %583 }
 0x84b   :  { %vm585_vm15 = vcmp.eq.f32.partialorder %v582_v49, %v584_v50  ;;  %v590_v20 = vcvt.f32.s32 %v584_v50 }
 0x84c   :  { %v586_v52 = vsel %vm585_vm15, %v581_v51, inf }
 0x84d   :  { %587 = vmin.xlane.f32.xlu0 %v586_v52  ;;  %v591_v36 = vshll.u32 %v590_v20, 16 }
 0x8da   :  { %v588_v33 = vpop.xlane.xlu0 %587 }
 0x8db   :  { %v589_v28 = vcvt.f32.s32 %v588_v33 }
 0x8dd   :  { %v592_v22 = vadd.s32 %v591_v36, %v589_v28 }
 0x8df   :  { %vm593_vm10 = vcmp.eq.s32.totalorder %v1880_v17, %v592_v22 }
 0x8e0   :  { %v594_v43 = vsel %vm593_vm10, %v1982_v4, 0.0 }
 0x8e1   :  { %v595_v31 = vadd.f32 %v594_v43, %v571_v42 }
 0x8e3   :  { %v606_v44 = vrot.slane %v595_v31, %v1908_v54  ;;  %v599_v45 = vrot.slane %v595_v31, %v1905_v53  ;;  %v627_v30 = vrot.slane %v595_v31, %v1920_v61  ;;  %v613_v17 = vrot.slane %v595_v31, %v1911_v55 }
 0x8e4   :  { %v641_v4 = vrot.slane %v595_v31, %v1928_v16  ;;  %v620_v46 = vrot.slane %v595_v31, %v1914_v56  ;;  %v634_v38 = vrot.slane %v595_v31, %v1924_v10  ;;  %v648_v34 = vrot.slane %v595_v31, %v1932_v23 }
 0x8e5   :  { %608 = vbcast.lane.b32.xlu0 %v606_v44, 256  ;;  %601 = vbcast.lane.b32.xlu1 %v599_v45, 256 }
 0x8e9   :  { %629 = vbcast.lane.b32.xlu0 %v627_v30, 256  ;;  %615 = vbcast.lane.b32.xlu1 %v613_v17, 256 }
 0x8ed   :  { %643 = vbcast.lane.b32.xlu0 %v641_v4, 256  ;;  %622 = vbcast.lane.b32.xlu1 %v620_v46, 256 }
 0x8f1   :  { %636 = vbcast.lane.b32.xlu1 %v634_v38, 256 }
 0x8f5   :  { %650 = vbcast.lane.b32.xlu1 %v648_v34, 256 }
 0x957   :  { %v609_v47 = vpop.permute.xlu0 %608  ;;  %v602_v39 = vpop.permute.xlu1 %601 }
 0x958   :  { %v2123_v41 = vmul.f32 %v609_v47, %v1845_v2  ;;  %v2126_v48 = vmul.f32 %v602_v39, %v1835_v0 }
 0x95a   :  { %v660_v49 = vpack.c.bf16 %v2123_v41, %v2126_v48 }
 0x95b   :  { %v616_v40 = vpop.permute.xlu1 %615  ;;  %v630_v50 = vpop.permute.xlu0 %629 }
 0x95c   :  { %1655 = vmatprep.mubr.bf16.mxu0 %v660_v49  ;;  %v2131_v52 = vmul.f32 %v616_v40, %v1840_v1  ;;  %v2139_v0 = vmul.f32 %v630_v50, %v1859_v8  ;;  %v1598_v49 = vld [vmem:[%s2292_s5] ss:$0 sm:$0xff] }
 0x95f   :  { %v623_v51 = vpop.permute.xlu1 %622  ;;  %v644_v62 = vpop.permute.xlu0 %643 }
 0x960   :  { %v2134_v58 = vmul.f32 %v623_v51, %v1852_v5  ;;  %v2147_v3 = vmul.f32 %v644_v62, %v1871_v12  ;;  %v16_v12 = vstv %s2290_s6 }
 0x961   :  { %17 = vst [vmem:[#allocation2] sm:$0x1] %v16_v12 }
 0x962   :  { %v661_v2 = vpack.c.bf16 %v2134_v58, %v2131_v52 }
 0x963   :  { %v637_v59 = vpop.permute.xlu1 %636 }
 0x964   :  { %v2142_v60 = vmul.f32 %v637_v59, %v1864_v9  ;;  %1656 = vmatmul.mubr.bf16.vlgmr.msra.gmra.mrb[0].mxu0 %v661_v2  ;;  %v892_v9 = vpop.f32.mrb[0].mxu1 }
 0x965   :  { %v1681_v6 = vpop.f32.mrb[1].mxu1  ;;  %v899_v26 = vcombine.high %v892_v9, %v892_v9 }
 0x966   :  { %v662_v63 = vpack.c.bf16 %v2142_v60, %v2139_v0  ;;  %v895_v7 = vpop.f32.mrb[2].mxu1 }
 0x967   :  { %v651_v1 = vpop.permute.xlu1 %650  ;;  %v1682_v11 = vpop.f32.mrb[3].mxu1 }
 0x968   :  { %v2150_v5 = vmul.f32 %v651_v1, %v1876_v13  ;;  %1659 = vmatprep.mubr.bf16.mxu0 %v662_v63  ;;  %v901_v13 = vunpack.c.l.s4 %v1776_v14 }
 0x96a   :  { %v663_v8 = vpack.c.bf16 %v2150_v5, %v2147_v3  ;;  %v902_v15 = vunpack.c.0.s8 %v901_v13 }
 0x96c   :  { %1660 = vmatmul.mubr.bf16.gmra.mrb[4].mxu0 %v663_v8  ;;  %v905_v19 = vsub.s32 %v902_v15, %v1882_v18  ;;  %v1597_v18 = vld [vmem:[%s2291_s4] ss:$0 sm:$0xff] }
 0x96d   :  { %1699 = vmatprep.mubr.msk.bf16.mxu0 %vm1775_vm8, %v1774_v57 }
 0x96e   :  { %v906_v20 = vrot.slane %v892_v9, %v905_v19  ;;  %v913_v28 = vrot.slane %v899_v26, %v905_v19 }
 0x970   :  { %v914_v24 = vcombine.high %v906_v20, %v906_v20  ;;  %v922_v33 = vrot.slane %v906_v20, %v905_v19  ;;  %v915_v22 = vcombine.high %v913_v28, %v913_v28  ;;  %v929_v27 = vrot.slane %v913_v28, %v905_v19 }
 0x972   :  { %v936_v36 = vrot.slane %v914_v24, %v905_v19  ;;  %v944_v32 = vcombine.high %v922_v33, %v922_v33  ;;  %v951_v29 = vrot.slane %v922_v33, %v1905_v53  ;;  %v943_v35 = vrot.slane %v915_v22, %v905_v19 }
 0x973   :  { %v945_v34 = vcombine.high %v929_v27, %v929_v27  ;;  %v967_v9 = vrot.slane %v929_v27, %v1905_v53 }
 0x974   :  { %v946_v25 = vcombine.high %v936_v36, %v936_v36  ;;  %v959_v37 = vrot.slane %v944_v32, %v1905_v53  ;;  %v955_v31 = vrot.slane %v936_v36, %v1905_v53  ;;  %v947_v40 = vcombine.high %v943_v35, %v943_v35 }
 0x975   :  { %v975_v62 = vrot.slane %v945_v34, %v1905_v53  ;;  %v971_v20 = vrot.slane %v943_v35, %v1905_v53 }
 0x976   :  { %v963_v42 = vrot.slane %v946_v25, %v1905_v53  ;;  %v979_v6 = vrot.slane %v947_v40, %v1905_v53 }
 0xa37   :  { %v1657_v43 = vpop.f32.mrb[0].mxu0 }
 0xa38   :  { %v990_v44 = vadd.f32 %v1657_v43, %v959_v37  ;;  %v762_v45 = vpop.f32.mrb[1].mxu0 }
 0xa39   :  { %v988_v30 = vadd.f32 %v951_v29, %v762_v45  ;;  %v1658_v17 = vpop.f32.mrb[2].mxu0 }
 0xa3a   :  { %v1005_v4 = vadd.f32 %v1597_v18, %v990_v44  ;;  %v991_v46 = vadd.f32 %v1658_v17, %v963_v42  ;;  %v765_v38 = vpop.f32.mrb[3].mxu0 }
 0xa3b   :  { %v1003_v47 = vadd.f32 %v1597_v18, %v988_v30  ;;  %v989_v39 = vadd.f32 %v955_v31, %v765_v38 }
 0xa3c   :  { %v1013_v50 = vmax.f32 %v1005_v4, 0.0  ;;  %v1006_v51 = vadd.f32 %v1597_v18, %v991_v46 }
 0xa3d   :  { %v1011_v2 = vmax.f32 %v1003_v47, 0.0  ;;  %v1004_v59 = vadd.f32 %v1597_v18, %v989_v39  ;;  %v1599_v47 = vld [vmem:[#allocation2] ss:$0 sm:$0xff] }
 0xa3e   :  { %v1028_v63 = vmul.f32 %v1598_v49, %v1013_v50  ;;  %v1014_v7 = vmax.f32 %v1006_v51, 0.0 }
 0xa3f   :  { %v1012_v1 = vmax.f32 %v1004_v59, 0.0  ;;  %v1661_v8 = vpop.f32.mrb[4].mxu0  ;;  %v1026_v13 = vmul.f32 %v1598_v49, %v1011_v2 }
 0xa40   :  { %v994_v11 = vadd.f32 %v1661_v8, %v975_v62  ;;  %v778_v12 = vpop.f32.mrb[5].mxu0  ;;  %v1041_v14 = vsel %vm1034_vm9, %v1028_v63, 0.0  ;;  %v1029_v27 = vmul.f32 %v1598_v49, %v1014_v7 }
 0xa41   :  { %v992_v15 = vadd.f32 %v967_v9, %v778_v12  ;;  %1042 = vadd.xlane.f32.xlu0 %v1041_v14  ;;  %v1662_v19 = vpop.f32.mrb[6].mxu0  ;;  %v1027_v24 = vmul.f32 %v1598_v49, %v1012_v1  ;;  %v1035_v29 = vsel %vm1034_vm9, %v1026_v13, 0.0 }
 0xa42   :  { %v1009_v26 = vadd.f32 %v1597_v18, %v994_v11  ;;  %v995_v33 = vadd.f32 %v1662_v19, %v979_v6  ;;  %v781_v36 = vpop.f32.mrb[7].mxu0  ;;  %v1044_v45 = vsel %vm1034_vm9, %v1029_v27, 0.0 }
 0xa43   :  { %v1007_v28 = vadd.f32 %v1597_v18, %v992_v15  ;;  %v993_v32 = vadd.f32 %v971_v20, %v781_v36  ;;  %v1038_v25 = vsel %vm1034_vm9, %v1027_v24, 0.0 }
 0xa44   :  { %v1017_v22 = vmax.f32 %v1009_v26, 0.0  ;;  %v1010_v37 = vadd.f32 %v1597_v18, %v995_v33  ;;  %1039 = vadd.xlane.f32.xlu1 %v1038_v25 }
 0xa45   :  { %v1015_v42 = vmax.f32 %v1007_v28, 0.0  ;;  %v1008_v43 = vadd.f32 %v1597_v18, %v993_v32  ;;  %1036 = vadd.xlane.f32.xlu0 %v1035_v29 }
 0xa46   :  { %v1032_v31 = vmul.f32 %v1598_v49, %v1017_v22  ;;  %v1018_v35 = vmax.f32 %v1010_v37, 0.0 }
 0xa47   :  { %v1016_v44 = vmax.f32 %v1008_v43, 0.0  ;;  %v1030_v17 = vmul.f32 %v1598_v49, %v1015_v42 }
 0xa48   :  { %v1053_v30 = vsel %vm1034_vm9, %v1032_v31, 0.0  ;;  %v1033_v34 = vmul.f32 %v1598_v49, %v1018_v35 }
 0xa49   :  { %1045 = vadd.xlane.f32.xlu0 %v1044_v45  ;;  %1054 = vadd.xlane.f32.xlu1 %v1053_v30  ;;  %v1031_v4 = vmul.f32 %v1598_v49, %v1016_v44  ;;  %v1047_v38 = vsel %vm1034_vm9, %v1030_v17, 0.0 }
 0xa4a   :  { %v1056_v18 = vsel %vm1034_vm9, %v1033_v34, 0.0 }
 0xa4b   :  { %v1050_v46 = vsel %vm1034_vm9, %v1031_v4, 0.0 }
 0xa4d   :  { %1048 = vadd.xlane.f32.xlu1 %v1047_v38  ;;  %1051 = vadd.xlane.f32.xlu0 %v1050_v46 }
 0xa51   :  { %1057 = vadd.xlane.f32.xlu0 %v1056_v18 }
 0xa5e   :  { %1066 = vperm.xlu1 %1707, %v1599_v47  }
 0xace   :  { %v1043_v39 = vpop.xlane.xlu0 %1042 }
 0xad1   :  { %v1040_v40 = vpop.xlane.xlu1 %1039 }
 0xad2   :  { %v1037_v50 = vpop.xlane.xlu0 %1036 }
 0xad6   :  { %v1046_v51 = vpop.xlane.xlu0 %1045  ;;  %v1055_v2 = vpop.xlane.xlu1 %1054 }
 0xada   :  { %v1052_v59 = vpop.xlane.xlu0 %1051  ;;  %v1049_v62 = vpop.xlane.xlu1 %1048 }
 0xade   :  { %v1067_v63 = vpop.permute.xlu1 %1066  ;;  %v1058_v49 = vpop.xlane.xlu0 %1057 }
 0xadf   :  { %v1069_v1 = vadd.f32 %v1067_v63, %v1037_v50  ;;  %v1070_v8 = vadd.f32 %v1067_v63, %v1040_v40  ;;  %v1071_v9 = vadd.f32 %v1067_v63, %v1043_v39  ;;  %v1072_v6 = vadd.f32 %v1067_v63, %v1046_v51 }
 0xae0   :  { %v1073_v7 = vadd.f32 %v1067_v63, %v1049_v62  ;;  %v1074_v11 = vadd.f32 %v1067_v63, %v1052_v59  ;;  %v1075_v15 = vadd.f32 %v1067_v63, %v1055_v2  ;;  %v1076_v19 = vadd.f32 %v1067_v63, %v1058_v49 }
 0xae1   :  { %v1088_v12 = vrot.slane %v1069_v1, %v1886_v21  ;;  %v1092_v14 = vrot.slane %v1070_v8, %v1886_v21  ;;  %v1096_v13 = vrot.slane %v1071_v9, %v1886_v21  ;;  %v1100_v20 = vrot.slane %v1072_v6, %v1886_v21 }
 0xae2   :  { %v1104_v26 = vrot.slane %v1073_v7, %v1886_v21  ;;  %v1108_v36 = vrot.slane %v1074_v11, %v1886_v21  ;;  %v1112_v32 = vrot.slane %v1075_v15, %v1886_v21  ;;  %v1116_v22 = vrot.slane %v1076_v19, %v1886_v21 }
 0xae3   :  { %v1117_v24 = vsel %vm121_vm0, %v1092_v14, %v1088_v12 }
 0xae4   :  { %v1118_v33 = vsel %vm123_vm1, %v1096_v13, %v1117_v24 }
 0xae5   :  { %v1119_v28 = vsel %vm125_vm2, %v1100_v20, %v1118_v33 }
 0xae6   :  { %v1120_v25 = vsel %vm127_vm3, %v1104_v26, %v1119_v28 }
 0xae7   :  { %v1121_v37 = vsel %vm129_vm4, %v1108_v36, %v1120_v25 }
 0xae8   :  { %v1122_v29 = vsel %vm131_vm5, %v1112_v32, %v1121_v37 }
 0xae9   :  { %v1123_v27 = vsel %vm133_vm6, %v1116_v22, %v1122_v29 }
 0xaea   :  { %v1125_v42 = vsel %vm136_vm7, %v1123_v27, -inf }
 0xaeb   :  { %1126 = vmax.xlane.f32.xlu0 %v1125_v42 }
 0xb78   :  { %v1127_v43 = vpop.xlane.xlu0 %1126 }
 0xb79   :  { %v1132_v31 = vrot.slane %v1127_v43, %v1905_v53  ;;  %v1136_v44 = vrot.slane %v1127_v43, %v1908_v54  ;;  %v1140_v35 = vrot.slane %v1127_v43, %v1911_v55  ;;  %v1148_v45 = vrot.slane %v1127_v43, %v1920_v61 }
 0xb7a   :  { %v1156_v30 = vrot.slane %v1127_v43, %v1928_v16  ;;  %v1144_v46 = vrot.slane %v1127_v43, %v1914_v56  ;;  %v1152_v50 = vrot.slane %v1127_v43, %v1924_v10  ;;  %v1160_v62 = vrot.slane %v1127_v43, %v1932_v23 }
 0xb7b   :  { %v1169_v17 = vsub.f32 %v1069_v1, %v1132_v31  ;;  %v1170_v4 = vsub.f32 %v1070_v8, %v1136_v44  ;;  %v1171_v38 = vsub.f32 %v1071_v9, %v1140_v35  ;;  %v1173_v34 = vsub.f32 %v1073_v7, %v1148_v45 }
 0xb7c   :  { %v1175_v39 = vsub.f32 %v1075_v15, %v1156_v30  ;;  %v1172_v51 = vsub.f32 %v1072_v6, %v1144_v46  ;;  %v1174_v63 = vsub.f32 %v1074_v11, %v1152_v50  ;;  %v1176_v8 = vsub.f32 %v1076_v19, %v1160_v62 }
 0xb7d   :  { %v1177_v18 = vmul.f32 1.442695, %v1169_v17  ;;  %v1179_v47 = vmul.f32 1.442695, %v1170_v4  ;;  %v1185_v40 = vmul.f32 1.442695, %v1173_v34 }
 0xb7e   :  { %v1181_v2 = vmul.f32 1.442695, %v1171_v38  ;;  %v1189_v59 = vmul.f32 1.442695, %v1175_v39  ;;  %v1183_v1 = vmul.f32 1.442695, %v1172_v51 }
 0xb7f   :  { %1751 = vpow2.f32 %v1177_v18  ;;  %v1187_v9 = vmul.f32 1.442695, %v1174_v63  ;;  %v1191_v12 = vmul.f32 1.442695, %v1176_v8 }
 0xb80   :  { %1753 = vpow2.f32 %v1179_v47 }
 0xb81   :  { %1755 = vpow2.f32 %v1185_v40 }
 0xb82   :  { %1757 = vpow2.f32 %v1181_v2 }
 0xb83   :  { %1759 = vpow2.f32 %v1189_v59 }
 0xb84   :  { %1761 = vpow2.f32 %v1183_v1 }
 0xb85   :  { %1763 = vpow2.f32 %v1187_v9 }
 0xb86   :  { %1765 = vpow2.f32 %v1191_v12  ;;  %v1731_v12 = vld [vmem:[%s2293_s7 + $0x30] sm:$0xff]  }
 0xb89   :  { %v1752_v49 = vpop.eup %1751 }
 0xb8a   :  { %v1754_v7 = vpop.eup %1753  ;;  %1202 = vperm.xlu0 %1708, %v1752_v49  }
 0xb8b   :  { %1205 = vperm.xlu1 %1707, %v1754_v7   ;;  %v1756_v6 = vpop.eup %1755 }
 0xb8c   :  { %v1758_v14 = vpop.eup %1757 }
 0xb8d   :  { %v1760_v13 = vpop.eup %1759 }
 0xb8e   :  { %1214 = vperm.xlu0 %1708, %v1756_v6   ;;  %v1762_v15 = vpop.eup %1761 }
 0xb8f   :  { %1208 = vperm.xlu1 %1707, %v1758_v14   ;;  %v1764_v11 = vpop.eup %1763 }
 0xb90   :  { %v1766_v19 = vpop.eup %1765 }
 0xb92   :  { %1220 = vperm.xlu0 %1708, %v1760_v13  }
 0xb93   :  { %1211 = vperm.xlu1 %1707, %v1762_v15  }
 0xb97   :  { %1217 = vperm.xlu1 %1707, %v1764_v11  }
 0xb9b   :  { %1223 = vperm.xlu1 %1707, %v1766_v19  }
 0xc09   :  { %v1203_v24 = vpop.permute.xlu0 %1202 }
 0xc0a   :  { %v1206_v20 = vpop.permute.xlu1 %1205  ;;  %v1228_v36 = vrot.slane %v1203_v24, %v1886_v21 }
 0xc0b   :  { %v1232_v33 = vrot.slane %v1206_v20, %v1886_v21 }
 0xc0d   :  { %v1215_v32 = vpop.permute.xlu0 %1214  ;;  %v1257_v22 = vsel %vm121_vm0, %v1232_v33, %v1228_v36 }
 0xc0e   :  { %v1209_v26 = vpop.permute.xlu1 %1208  ;;  %v1244_v42 = vrot.slane %v1215_v32, %v1886_v21 }
 0xc0f   :  { %v1236_v28 = vrot.slane %v1209_v26, %v1886_v21 }
 0xc11   :  { %v1258_v29 = vsel %vm123_vm1, %v1236_v28, %v1257_v22  ;;  %v1221_v31 = vpop.permute.xlu0 %1220 }
 0xc12   :  { %v1212_v25 = vpop.permute.xlu1 %1211  ;;  %v1252_v30 = vrot.slane %v1221_v31, %v1886_v21 }
 0xc13   :  { %v1240_v37 = vrot.slane %v1212_v25, %v1886_v21 }
 0xc15   :  { %v1259_v27 = vsel %vm125_vm2, %v1240_v37, %v1258_v29 }
 0xc16   :  { %v1218_v43 = vpop.permute.xlu1 %1217  ;;  %v1260_v35 = vsel %vm127_vm3, %v1244_v42, %v1259_v27 }
 0xc17   :  { %v1248_v44 = vrot.slane %v1218_v43, %v1886_v21 }
 0xc19   :  { %v1261_v45 = vsel %vm129_vm4, %v1248_v44, %v1260_v35 }
 0xc1a   :  { %v1224_v17 = vpop.permute.xlu1 %1223  ;;  %v1262_v46 = vsel %vm131_vm5, %v1252_v30, %v1261_v45 }
 0xc1b   :  { %v1256_v4 = vrot.slane %v1224_v17, %v1886_v21 }
 0xc1d   :  { %v1263_v38 = vsel %vm133_vm6, %v1256_v4, %v1262_v46 }
 0xc1e   :  { %v1265_v34 = vsel %vm136_vm7, %v1263_v38, 0.0 }
 0xc1f   :  { %1266 = vadd.xlane.f32.xlu0 %v1265_v34 }
 0xcac   :  { %v1267_v18 = vpop.xlane.xlu0 %1266 }
 0xcad   :  { %1767 = vrcp.f32 %v1267_v18 }
 0xcb7   :  { %v1768_v47 = vpop.eup %1767 }
 0xcb8   :  { %v1273_v39 = vrot.slane %v1768_v47, %v1905_v53  ;;  %v1277_v50 = vrot.slane %v1768_v47, %v1908_v54  ;;  %v1281_v2 = vrot.slane %v1768_v47, %v1911_v55  ;;  %v1285_v59 = vrot.slane %v1768_v47, %v1914_v56  ;;  %v1725_v56 = vld [vmem:[%s2293_s7] sm:$0xff]  }
 0xcb9   :  { %v1289_v63 = vrot.slane %v1768_v47, %v1920_v61  ;;  %v1293_v8 = vrot.slane %v1768_v47, %v1924_v10  ;;  %v1297_v54 = vrot.slane %v1768_v47, %v1928_v16  ;;  %v1301_v55 = vrot.slane %v1768_v47, %v1932_v23  ;;  %1684 = vmatpush3.bf16.msra.mxu0 %v1725_v56  ;;  %v1726_v10 = vld [vmem:[%s2293_s7 + $0x8] sm:$0xff]   ;;  %v1727_v16 = vld [vmem:[%s2293_s7 + $0x10] sm:$0xff]   ;;  %v1728_v23 = vld [vmem:[%s2293_s7 + $0x18] sm:$0xff]  }
 0xcba   :  { %v1310_v40 = vmul.f32 %v1752_v49, %v1273_v39  ;;  %v1311_v51 = vmul.f32 %v1754_v7, %v1277_v50  ;;  %v1312_v21 = vmul.f32 %v1758_v14, %v1281_v2  ;;  %v1313_v62 = vmul.f32 %v1762_v15, %v1285_v59  ;;  %1685 = vmatprep.subr.bf16.mxu0 %v1774_v57  ;;  %v1729_v49 = vld [vmem:[%s2293_s7 + $0x20] sm:$0xff]   ;;  %v1730_v7 = vld [vmem:[%s2293_s7 + $0x28] sm:$0xff]  }
 0xcbb   :  { %v1314_v1 = vmul.f32 %v1756_v6, %v1289_v63  ;;  %v1315_v53 = vmul.f32 %v1764_v11, %v1293_v8  ;;  %v1316_v9 = vmul.f32 %v1760_v13, %v1297_v54  ;;  %v1317_v61 = vmul.f32 %v1766_v19, %v1301_v55  ;;  %v1732_v6 = vld [vmem:[%s2293_s7 + $0x38] sm:$0xff]  }
 0xcbc   :  { %1320 = vperm.xlu1 %1707, %v1310_v40  }
 0xcbd   :  { %1686 = vmatpush3.bf16.msra.mxu0 %v1726_v10 }
 0xcbe   :  { %1687 = vmatprep.subr.bf16.mxu0 %v1774_v57 }
 0xcc0   :  { %1325 = vperm.xlu1 %1707, %v1311_v51  }
 0xcc1   :  { %1688 = vmatpush3.bf16.msra.mxu0 %v1727_v16 }
 0xcc2   :  { %1689 = vmatprep.subr.bf16.mxu0 %v1774_v57 }
 0xcc4   :  { %1330 = vperm.xlu1 %1707, %v1312_v21  }
 0xcc5   :  { %1690 = vmatpush3.bf16.msra.mxu0 %v1728_v23 }
 0xcc6   :  { %1691 = vmatprep.subr.bf16.mxu0 %v1774_v57 }
 0xcc8   :  { %1335 = vperm.xlu1 %1707, %v1313_v62  }
 0xcc9   :  { %1692 = vmatpush3.bf16.msra.mxu0 %v1729_v49 }
 0xcca   :  { %1693 = vmatprep.subr.bf16.mxu0 %v1774_v57 }
 0xccc   :  { %1340 = vperm.xlu1 %1707, %v1314_v1  }
 0xccd   :  { %1694 = vmatpush3.bf16.msra.mxu0 %v1730_v7 }
 0xcce   :  { %1695 = vmatprep.subr.bf16.mxu0 %v1774_v57 }
 0xcd0   :  { %1345 = vperm.xlu1 %1707, %v1315_v53  }
 0xcd1   :  { %1696 = vmatpush3.bf16.msra.mxu0 %v1731_v12 }
 0xcd2   :  { %1697 = vmatprep.subr.bf16.mxu0 %v1774_v57 }
 0xcd4   :  { %1350 = vperm.xlu1 %1707, %v1316_v9  }
 0xcd5   :  { %1698 = vmatpush3.bf16.msra.mxu0 %v1732_v6 }
 0xcd8   :  { %1355 = vperm.xlu1 %1707, %v1317_v61  }
 0xd3b   :  { %v1321_v14 = vpop.permute.xlu1 %1320 }
 0xd3c   :  { %v1358_v11 = vmul.f32 %v1321_v14, %v2126_v48 }
 0xd3e   :  { %v1366_v26 = vrot.slane %v1358_v11, 4 }
 0xd3f   :  { %v1326_v13 = vpop.permute.xlu1 %1325 }
 0xd40   :  { %v1359_v15 = vmul.f32 %v1326_v13, %v2123_v41  ;;  %v1367_v25 = vadd.f32 %v1366_v26, %v1358_v11 }
 0xd42   :  { %v1372_v20 = vrot.slane %v1359_v15, 4  ;;  %v1368_v42 = vrot.slane %v1367_v25, 2 }
 0xd43   :  { %v1331_v19 = vpop.permute.xlu1 %1330 }
 0xd44   :  { %v1360_v24 = vmul.f32 %v1331_v19, %v2131_v52  ;;  %v1373_v28 = vadd.f32 %v1372_v20, %v1359_v15  ;;  %v1369_v45 = vadd.f32 %v1368_v42, %v1367_v25 }
 0xd46   :  { %v1378_v33 = vrot.slane %v1360_v24, 4  ;;  %v1374_v29 = vrot.slane %v1373_v28, 2  ;;  %v1370_v39 = vrot.slane %v1369_v45, 1 }
 0xd47   :  { %v1336_v36 = vpop.permute.xlu1 %1335 }
 0xd48   :  { %v1361_v32 = vmul.f32 %v1336_v36, %v2134_v58  ;;  %v1379_v22 = vadd.f32 %v1378_v33, %v1360_v24  ;;  %v1375_v52 = vadd.f32 %v1374_v29, %v1373_v28  ;;  %v1371_v8 = vadd.f32 %v1370_v39, %v1369_v45 }
 0xd4a   :  { %v1384_v57 = vrot.slane %v1361_v32, 4  ;;  %v1380_v41 = vrot.slane %v1379_v22, 2  ;;  %v1376_v34 = vrot.slane %v1375_v52, 1  ;;  %v1414_v7 = vpack.c.bf16 %v1371_v8, %v1371_v8 }
 0xd4b   :  { %v1341_v37 = vpop.permute.xlu1 %1340 }
 0xd4c   :  { %v1385_v27 = vadd.f32 %v1384_v57, %v1361_v32  ;;  %v1362_v48 = vmul.f32 %v1341_v37, %v2139_v0  ;;  %v1381_v30 = vadd.f32 %v1380_v41, %v1379_v22  ;;  %v1453_v24 = vunpack.c.l.b16 %v1414_v7 }
 0xd4e   :  { %v1386_v43 = vrot.slane %v1385_v27, 2  ;;  %v1390_v31 = vrot.slane %v1362_v48, 4  ;;  %v1382_v40 = vrot.slane %v1381_v30, 1 }
 0xd4f   :  { %v1346_v44 = vpop.permute.xlu1 %1345 }
 0xd50   :  { %v1363_v35 = vmul.f32 %v1346_v44, %v2142_v60  ;;  %v1391_v17 = vadd.f32 %v1390_v31, %v1362_v48  ;;  %v1387_v58 = vadd.f32 %v1386_v43, %v1385_v27  ;;  %v1377_v60 = vadd.f32 %v1376_v34, %v1375_v52  ;;  %v1600_v52 = vld [vmem:[%s2294_s8] ss:$0 sm:$0xff] }
 0xd51   :  { %v1383_v53 = vadd.f32 %v1382_v40, %v1381_v30 }
 0xd52   :  { %v1396_v4 = vrot.slane %v1363_v35, 4  ;;  %v1392_v46 = vrot.slane %v1391_v17, 2  ;;  %v1388_v50 = vrot.slane %v1387_v58, 1  ;;  %v1415_v61 = vpack.c.bf16 %v1377_v60, %v1377_v60 }
 0xd53   :  { %v1351_v38 = vpop.permute.xlu1 %1350  ;;  %v1416_v49 = vpack.c.bf16 %v1383_v53, %v1383_v53 }
 0xd54   :  { %v1397_v18 = vadd.f32 %v1396_v4, %v1363_v35  ;;  %v1364_v47 = vmul.f32 %v1351_v38, %v2147_v3  ;;  %v1393_v0 = vadd.f32 %v1392_v46, %v1391_v17  ;;  %v1389_v54 = vadd.f32 %v1388_v50, %v1387_v58 }
 0xd55   :  { %v1454_v15 = vunpack.c.l.b16 %v1415_v61  ;;  %v1455_v20 = vunpack.c.l.b16 %v1416_v49 }
 0xd56   :  { %v1398_v51 = vrot.slane %v1397_v18, 2  ;;  %v1402_v2 = vrot.slane %v1364_v47, 4  ;;  %v1394_v21 = vrot.slane %v1393_v0, 1  ;;  %v1417_v12 = vpack.c.bf16 %v1389_v54, %v1389_v54 }
 0xd57   :  { %v1356_v59 = vpop.permute.xlu1 %1355  ;;  %v1461_v32 = vsel %vm121_vm0, %v1454_v15, %v1453_v24  ;;  %vm1558_vm0 = vcmask 23552  }
 0xd58   :  { %v1399_v62 = vadd.f32 %v1398_v51, %v1397_v18  ;;  %v1403_v63 = vadd.f32 %v1402_v2, %v1364_v47  ;;  %v1365_v1 = vmul.f32 %v1356_v59, %v2150_v5  ;;  %v1395_v3 = vadd.f32 %v1394_v21, %v1393_v0 }
 0xd59   :  { %v1456_v26 = vunpack.c.l.b16 %v1417_v12  ;;  %v1462_v57 = vsel %vm123_vm1, %v1455_v20, %v1461_v32 }
 0xd5a   :  { %v1400_v9 = vrot.slane %v1399_v62, 1  ;;  %v1404_v55 = vrot.slane %v1403_v63, 2  ;;  %v1408_v56 = vrot.slane %v1365_v1, 4  ;;  %v1418_v13 = vpack.c.bf16 %v1395_v3, %v1395_v3 }
 0xd5b   :  { %v1463_v29 = vsel %vm125_vm2, %v1456_v26, %v1462_v57 }
 0xd5c   :  { %v1401_v10 = vadd.f32 %v1400_v9, %v1399_v62  ;;  %v1405_v16 = vadd.f32 %v1404_v55, %v1403_v63  ;;  %v1409_v23 = vadd.f32 %v1408_v56, %v1365_v1  ;;  %v1457_v28 = vunpack.c.l.b16 %v1418_v13 }
 0xd5e   :  { %v1406_v6 = vrot.slane %v1405_v16, 1  ;;  %v1410_v14 = vrot.slane %v1409_v23, 2  ;;  %v1419_v11 = vpack.c.bf16 %v1401_v10, %v1401_v10  ;;  %v1464_v42 = vsel %vm127_vm3, %v1457_v28, %v1463_v29 }
 0xd60   :  { %v1407_v5 = vadd.f32 %v1406_v6, %v1405_v16  ;;  %v1411_v19 = vadd.f32 %v1410_v14, %v1409_v23  ;;  %v1458_v25 = vunpack.c.l.b16 %v1419_v11 }
 0xd62   :  { %v1420_v33 = vpack.c.bf16 %v1407_v5, %v1407_v5  ;;  %v1412_v36 = vrot.slane %v1411_v19, 1  ;;  %v1465_v41 = vsel %vm129_vm4, %v1458_v25, %v1464_v42 }
 0xd64   :  { %v1413_v22 = vadd.f32 %v1412_v36, %v1411_v19  ;;  %v1459_v37 = vunpack.c.l.b16 %v1420_v33 }
 0xd66   :  { %v1421_v27 = vpack.c.bf16 %v1413_v22, %v1413_v22  ;;  %v1466_v43 = vsel %vm131_vm5, %v1459_v37, %v1465_v41 }
 0xd68   :  { %v1460_v48 = vunpack.c.l.b16 %v1421_v27 }
 0xd6a   :  { %v1467_v31 = vsel %vm133_vm6, %v1460_v48, %v1466_v43 }
 0xd6b   :  { %v1468_v44 = vpack.c.b16 %v1467_v31, %v1467_v31 }
 0xd6d   :  { %1700 = vmatmul.mubr.bf16.vlgmr.msra.gmra.mrb[8].mxu0 %v1468_v44 }
 0xe40   :  { %v1552_v35 = vpop.f32.mrb[8].mxu0 }
 0xe41   :  { %v1553_v45 = vadd.f32 %v1600_v52, %v1552_v35  ;;  %v1701_v30 = vpop.f32.mrb[9].mxu0 }
 0xe42   :  { %v1555_v17 = vpop.f32.mrb[10].mxu0 }
 0xe43   :  { %v1702_v58 = vpop.f32.mrb[11].mxu0  ;;  %v1559_v4 = vsel %vm1558_vm0, %v1553_v45, -inf }
 0xe44   :  { %1560 = vmax.xlane.f32.xlu0 %v1559_v4 }
 0xed1   :  { %v1561_v46 = vpop.xlane.xlu0 %1560 }
 0xed2   :  { %v1562_v38 = vsub.f32 %v1553_v45, %v1561_v46 }
 0xed4   :  { %v1563_v34 = vmul.f32 1.442695, %v1562_v38 }
 0xed6   :  { %1769 = vpow2.f32 %v1563_v34 }
 0xee0   :  { %v1770_v18 = vpop.eup %1769 }
 0xee1   :  { %v1565_v47 = vsel %vm1558_vm0, %v1770_v18, 0.0 }
 0xee2   :  { %1566 = vadd.xlane.f32.xlu1 %v1565_v47 }
 0xf6f   :  { %v1567_v39 = vpop.xlane.xlu1 %1566 }
 0xf70   :  { %1771 = vlog2.f32 %v1567_v39 }
 0xf7a   :  { %v1772_v40 = vpop.eup %1771 }
 0xf7b   :  { %v1569_v0 = vmul.f32 0.6931472, %v1772_v40 }
 0xf7d   :  { %v1570_v50 = vadd.f32 %v1569_v0, %v1561_v46 }
 0xf7f   :  { %v1571_v51 = vsub.f32 %v1553_v45, %v1570_v50 }
 0xf81   :  { %1572 = vst.msk [vmem:[%s2295_s10] sm:$0xff] %vm1558_vm0, %v1571_v51 }

</bundles_post_ra>
